<compile_context>
chip_gen: v5e
topology: v5e:2x2
jax: 0.10.0
libtpu: 0.0.40
codegen_flags: <defaults>
</compile_context>

<pallas_src>
import functools

import numpy as np
import jax
import jax.numpy as jnp
from jax.experimental import pallas as pl
from jax.experimental.pallas import tpu as pltpu


# ---------------- the fused per-image kernel ----------------

def _lenet_kernel(x_ref, a1_ref, b1_ref, a2_ref, b2_ref,
                  fw1_ref, fb1_ref, fw2_ref, fb2_ref, fw3_ref, fb3_ref,
                  o_ref, p1_ref, p2_ref, p3_ref):
    f32 = jnp.float32

    # ---- conv1 (5x5, 3->6, valid): 5 banded matmuls, K=128 = (width offset j, cin) folded into A1.
    #      Output layout: rows = h (28 valid), lanes = (wo parity)*128 + (wo//2)*8 + cout.
    acc1 = jnp.dot(x_ref[0:28, :], a1_ref[0], preferred_element_type=f32)          # (28, 256)
    for i in range(1, 5):
        acc1 = acc1 + jnp.dot(x_ref[i:i + 28, :], a1_ref[i], preferred_element_type=f32)

    # ---- pool1 (2x2/2) + bias + relu  ->  conv2 input layout (rows = h, lanes = w*8 + c)
    p1_ref[0:28, :] = jnp.maximum(acc1[:, 0:128], acc1[:, 128:256])                # width pairs
    m1 = jnp.maximum(p1_ref[pl.ds(0, 14, stride=2), :],                            # height pairs
                     p1_ref[pl.ds(1, 14, stride=2), :])
    p2_ref[0:14, :] = jnp.maximum(m1 + b1_ref[...], 0.0)                           # (14, 128)

    # ---- conv2 (5x5, 6->16, valid): same scheme with A2 (K=128, N lanes = parity*128 + (wo//2)*16 + cout)
    acc2 = jnp.dot(p2_ref[0:10, :], a2_ref[0], preferred_element_type=f32)         # (10, 256)
    for i in range(1, 5):
        acc2 = acc2 + jnp.dot(p2_ref[i:i + 10, :], a2_ref[i], preferred_element_type=f32)

    # ---- pool2 (2x2/2) + bias + relu  ->  (5, 128): rows = h, lanes = w*16 + c (lanes 80..127 = 0)
    p3_ref[0:10, :] = jnp.maximum(acc2[:, 0:128], acc2[:, 128:256])
    m2 = jnp.maximum(p3_ref[pl.ds(0, 5, stride=2), :],
                     p3_ref[pl.ds(1, 5, stride=2), :])
    pooled2 = jnp.maximum(m2 + b2_ref[...], 0.0)                                   # (5, 128)

    # ---- classifier: PyTorch's channel-major view(-1, 400) is folded into FW1 at init,
    #      so fc1 contracts the pooled slab directly (no feature scatter / flatten in-kernel).
    h1 = jnp.dot(pooled2[0:1, :], fw1_ref[0], preferred_element_type=f32)          # (1, 120)
    for h in range(1, 5):
        h1 = h1 + jnp.dot(pooled2[h:h + 1, :], fw1_ref[h], preferred_element_type=f32)
    h1 = jnp.maximum(h1 + fb1_ref[...], 0.0)
    h2 = jnp.maximum(jnp.dot(h1, fw2_ref[...], preferred_element_type=f32) + fb2_ref[...], 0.0)
    o_ref[0] = jnp.dot(h2, fw3_ref[...], preferred_element_type=f32) + fb3_ref[...]


# ---------------- wrapper ----------------

def lenet_forward(kp, x_nchw):
    """Forward pass matching LeNet.forward: NCHW input -> (B, 10) logits."""
    B, C, H, W = x_nchw.shape
    assert (C, H, W) == (3, 32, 32), "LeNet's classifier requires 3x32x32 inputs (16*5*5 = 400)"

    # Boundary layout only: NCHW -> rows = b*32+h, lanes = w*4+c (channels padded 3->4) = 128 lanes.
    x = jnp.transpose(x_nchw, (0, 2, 3, 1)).astype(jnp.float32)        # (B, 32, 32, 3)
    x = jnp.pad(x, ((0, 0), (0, 0), (0, 0), (0, 1)))                   # (B, 32, 32, 4)
    xin = x.reshape(B * 32, 128)

    args = (xin, kp["a1"], kp["b1"], kp["a2"], kp["b2"],
            kp["fw1"], kp["fb1"], kp["fw2"], kp["fb2"], kp["fw3"], kp["fb3"])

    def const_spec(a):
        nd = len(a.shape)
        return pl.BlockSpec(a.shape, lambda b, nd=nd: (0,) * nd)       # VMEM-resident weights

    in_specs = [pl.BlockSpec((32, 128), lambda b: (b, 0))] + [const_spec(a) for a in args[1:]]

    out = pl.pallas_call(
        _lenet_kernel,
        grid=(B,),                                                      # one image per grid step
        in_specs=in_specs,
        out_specs=pl.BlockSpec((1, 1, 10), lambda b: (b, 0, 0)),
        out_shape=jax.ShapeDtypeStruct((B, 1, 10), jnp.float32),
        scratch_shapes=[
            pltpu.VMEM((32, 128), jnp.float32),    # pool1 width-pooled staging
            pltpu.VMEM((16, 128), jnp.float32),    # conv2 input (pooled1 + bias + relu)
            pltpu.VMEM((16, 128), jnp.float32),    # pool2 width-pooled staging
        ],
        compiler_params=pltpu.CompilerParams(dimension_semantics=("parallel",)),
    )(*args)
    return out.reshape(B, 10)


# ---------------- parameters ----------------

def init_lenet_params(key):
    ks = jax.random.split(key, 10)

    def u(k, shape, fan_in):  # PyTorch-style uniform init
        bound = 1.0 / (fan_in ** 0.5)
        return jax.random.uniform(k, shape, jnp.float32, -bound, bound)

    return {
        "conv1_w": u(ks[0], (6, 3, 5, 5), 3 * 25),
        "conv1_b": u(ks[1], (6,), 3 * 25),
        "conv2_w": u(ks[2], (16, 6, 5, 5), 6 * 25),
        "conv2_b": u(ks[3], (16,), 6 * 25),
        "fc1_w": u(ks[4], (120, 400), 400),
        "fc1_b": u(ks[5], (120,), 400),
        "fc2_w": u(ks[6], (84, 120), 120),
        "fc2_b": u(ks[7], (84,), 120),
        "fc3_w": u(ks[8], (10, 84), 84),
        "fc3_b": u(ks[9], (10,), 84),
    }


def prepare_kernel_params(p):
    """One-time init-time layout work: fold the conv width offsets + channels into banded matmul
    weights (A1/A2), build lane-layout bias rows, and fold PyTorch's channel-major flatten into fc1."""
    w1 = np.asarray(p["conv1_w"], np.float32)    # (6, 3, 5, 5)  OIHW
    w2 = np.asarray(p["conv2_w"], np.float32)    # (16, 6, 5, 5)
    fc1w = np.asarray(p["fc1_w"], np.float32)    # (120, 400)

    # conv1: input lane = w*4 + cin;  output lane = (wo%2)*128 + (wo//2)*8 + cout
    a1 = np.zeros((5, 128, 256), np.float32)
    for i in range(5):
        for j in range(5):
            wij = w1[:, :, i, j].T               # (cin=3, cout=6)
            for wo in range(28):
                li = (wo + j) * 4
                lo = (wo % 2) * 128 + (wo // 2) * 8
                a1[i, li:li + 3, lo:lo + 6] = wij

    # conv2: input lane = w*8 + cin;  output lane = (wo%2)*128 + (wo//2)*16 + cout
    a2 = np.zeros((5, 128, 256), np.float32)
    for i in range(5):
        for j in range(5):
            wij = w2[:, :, i, j].T               # (cin=6, cout=16)
            for wo in range(10):
                li = (wo + j) * 8
                lo = (wo % 2) * 128 + (wo // 2) * 16
                a2[i, li:li + 6, lo:lo + 16] = wij

    # bias rows in the pooled lane layouts (zeros on pad lanes keep pad lanes exactly zero)
    b1row = np.zeros((1, 128), np.float32)
    for w in range(14):
        b1row[0, w * 8:w * 8 + 6] = np.asarray(p["conv1_b"], np.float32)
    b2row = np.zeros((1, 128), np.float32)
    for w in range(5):
        b2row[0, w * 16:w * 16 + 16] = np.asarray(p["conv2_b"], np.float32)

    # fc1 with PyTorch's (c, h, w) flatten order folded in: FW1[h, w*16+c, n] = fc1_w[n, c*25+h*5+w]
    fw1 = np.zeros((5, 128, 120), np.float32)
    for h in range(5):
        for w in range(5):
            for c in range(16):
                fw1[h, w * 16 + c, :] = fc1w[:, c * 25 + h * 5 + w]

    return {
        "a1": jnp.asarray(a1), "b1": jnp.asarray(b1row),
        "a2": jnp.asarray(a2), "b2": jnp.asarray(b2row),
        "fw1": jnp.asarray(fw1), "fb1": jnp.asarray(p["fc1_b"]).reshape(1, 120),
        "fw2": jnp.asarray(p["fc2_w"]).T, "fb2": jnp.asarray(p["fc2_b"]).reshape(1, 84),
        "fw3": jnp.asarray(p["fc3_w"]).T, "fb3": jnp.asarray(p["fc3_b"]).reshape(1, 10),
    }


# ---------------- pure-JAX reference (mirrors the PyTorch module) ----------------

def _lenet_reference(p, x):
    hi = jax.lax.Precision.HIGHEST

    def conv(t, w, b):
        y = jax.lax.conv_general_dilated(t, w, (1, 1), "VALID",
                                         dimension_numbers=("NCHW", "OIHW", "NCHW"),
                                         precision=hi)
        return y + b.reshape(1, -1, 1, 1)

    def pool(t):
        return jax.lax.reduce_window(t, -jnp.inf, jax.lax.max,
                                     (1, 1, 2, 2), (1, 1, 2, 2), "VALID")

    y = pool(jnp.maximum(conv(x, p["conv1_w"], p["conv1_b"]), 0.0))
    y = pool(jnp.maximum(conv(y, p["conv2_w"], p["conv2_b"]), 0.0))
    y = y.reshape(x.shape[0], -1)                          # channel-major, like torch .view(-1, 400)
    y = jnp.maximum(jnp.dot(y, p["fc1_w"].T, precision=hi) + p["fc1_b"], 0.0)
    y = jnp.maximum(jnp.dot(y, p["fc2_w"].T, precision=hi) + p["fc2_b"], 0.0)
    return jnp.dot(y, p["fc3_w"].T, precision=hi) + p["fc3_b"]


if __name__ == "__main__":
    key = jax.random.PRNGKey(0)
    k_x, k_p = jax.random.split(key)
    # LeNet's classifier requires 3x32x32 inputs so the flatten is exactly 16*5*5 = 400.
    x = jax.random.normal(k_x, (2, 3, 32, 32), jnp.float32)
    params = init_lenet_params(k_p)
    kparams = prepare_kernel_params(params)     # init-time layout work, not in the hot path

    out = jax.jit(lenet_forward)(kparams, x)
    out = jax.block_until_ready(out)
    assert out.shape == (2, 10) and out.dtype == jnp.float32
    assert bool(jnp.all(jnp.isfinite(out)))

    ref = jax.jit(_lenet_reference)(params, x)
    assert bool(jnp.allclose(out, ref, rtol=2e-2, atol=2e-2)), float(jnp.max(jnp.abs(out - ref)))

    print("KERNEL_OK")
</pallas_src>

<mosaic_0001>
module attributes {stable_mosaic.version = 11 : i64} {
  func.func @_lenet_kernel(%arg0: i32, %arg1: memref<32x128xf32, #tpu.memory_space<vmem>>, %arg2: memref<5x128x256xf32, #tpu.memory_space<vmem>>, %arg3: memref<1x128xf32, #tpu.memory_space<vmem>>, %arg4: memref<5x128x256xf32, #tpu.memory_space<vmem>>, %arg5: memref<1x128xf32, #tpu.memory_space<vmem>>, %arg6: memref<5x128x120xf32, #tpu.memory_space<vmem>>, %arg7: memref<1x120xf32, #tpu.memory_space<vmem>>, %arg8: memref<120x84xf32, #tpu.memory_space<vmem>>, %arg9: memref<1x84xf32, #tpu.memory_space<vmem>>, %arg10: memref<84x10xf32, #tpu.memory_space<vmem>>, %arg11: memref<1x10xf32, #tpu.memory_space<vmem>>, %arg12: memref<1x1x10xf32, #tpu.memory_space<vmem>>, %arg13: memref<32x128xf32, #tpu.memory_space<vmem>>, %arg14: memref<16x128xf32, #tpu.memory_space<vmem>>, %arg15: memref<16x128xf32, #tpu.memory_space<vmem>>) attributes {dimension_semantics = [#tpu.dimension_semantics<parallel>], iteration_bounds = array<i64: 2>, scalar_prefetch = 0 : i64, scratch_operands = 3 : i64, tpu.core_type = #tpu.core_type<tc>, window_params = [{transform_indices = @transform_0, window_bounds = array<i64: 32, 128>}, {pipeline_mode = #tpu.pipeline_mode<synchronous>, transform_indices = @transform_1, window_bounds = array<i64: 5, 128, 256>}, {pipeline_mode = #tpu.pipeline_mode<synchronous>, transform_indices = @transform_2, window_bounds = array<i64: 1, 128>}, {pipeline_mode = #tpu.pipeline_mode<synchronous>, transform_indices = @transform_3, window_bounds = array<i64: 5, 128, 256>}, {pipeline_mode = #tpu.pipeline_mode<synchronous>, transform_indices = @transform_4, window_bounds = array<i64: 1, 128>}, {pipeline_mode = #tpu.pipeline_mode<synchronous>, transform_indices = @transform_5, window_bounds = array<i64: 5, 128, 120>}, {pipeline_mode = #tpu.pipeline_mode<synchronous>, transform_indices = @transform_6, window_bounds = array<i64: 1, 120>}, {pipeline_mode = #tpu.pipeline_mode<synchronous>, transform_indices = @transform_7, window_bounds = array<i64: 120, 84>}, {pipeline_mode = #tpu.pipeline_mode<synchronous>, transform_indices = @transform_8, window_bounds = array<i64: 1, 84>}, {pipeline_mode = #tpu.pipeline_mode<synchronous>, transform_indices = @transform_9, window_bounds = array<i64: 84, 10>}, {pipeline_mode = #tpu.pipeline_mode<synchronous>, transform_indices = @transform_10, window_bounds = array<i64: 1, 10>}, {transform_indices = @transform_11, window_bounds = array<i64: 1, 1, 10>}]} {
    %c0 = arith.constant 0 : index
    %c0_0 = arith.constant 0 : index
    %0 = vector.load %arg1[%c0, %c0_0] : memref<32x128xf32, #tpu.memory_space<vmem>>, vector<28x128xf32>
    %c0_1 = arith.constant 0 : index
    %c0_2 = arith.constant 0 : index
    %c0_3 = arith.constant 0 : index
    %1 = vector.load %arg2[%c0_1, %c0_2, %c0_3] : memref<5x128x256xf32, #tpu.memory_space<vmem>>, vector<1x128x256xf32>
    %2 = vector.shape_cast %1 : vector<1x128x256xf32> to vector<128x256xf32>
    %cst = arith.constant dense<0.000000e+00> : vector<28x256xf32>
    %3 = tpu.matmul %0, %2, %cst {dimension_numbers = #tpu.dot_dimension_numbers<[1], [0], [0], [1], [0, 0, 1, 1], [], []>} : vector<28x128xf32>, vector<128x256xf32>, vector<28x256xf32> -> vector<28x256xf32>
    %c1 = arith.constant 1 : index
    %c0_4 = arith.constant 0 : index
    %4 = vector.load %arg1[%c1, %c0_4] : memref<32x128xf32, #tpu.memory_space<vmem>>, vector<28x128xf32>
    %c1_5 = arith.constant 1 : index
    %c0_6 = arith.constant 0 : index
    %c0_7 = arith.constant 0 : index
    %5 = vector.load %arg2[%c1_5, %c0_6, %c0_7] : memref<5x128x256xf32, #tpu.memory_space<vmem>>, vector<1x128x256xf32>
    %6 = vector.shape_cast %5 : vector<1x128x256xf32> to vector<128x256xf32>
    %cst_8 = arith.constant dense<0.000000e+00> : vector<28x256xf32>
    %7 = tpu.matmul %4, %6, %cst_8 {dimension_numbers = #tpu.dot_dimension_numbers<[1], [0], [0], [1], [0, 0, 1, 1], [], []>} : vector<28x128xf32>, vector<128x256xf32>, vector<28x256xf32> -> vector<28x256xf32>
    %8 = arith.addf %3, %7 : vector<28x256xf32>
    %c2 = arith.constant 2 : index
    %c0_9 = arith.constant 0 : index
    %9 = vector.load %arg1[%c2, %c0_9] : memref<32x128xf32, #tpu.memory_space<vmem>>, vector<28x128xf32>
    %c2_10 = arith.constant 2 : index
    %c0_11 = arith.constant 0 : index
    %c0_12 = arith.constant 0 : index
    %10 = vector.load %arg2[%c2_10, %c0_11, %c0_12] : memref<5x128x256xf32, #tpu.memory_space<vmem>>, vector<1x128x256xf32>
    %11 = vector.shape_cast %10 : vector<1x128x256xf32> to vector<128x256xf32>
    %cst_13 = arith.constant dense<0.000000e+00> : vector<28x256xf32>
    %12 = tpu.matmul %9, %11, %cst_13 {dimension_numbers = #tpu.dot_dimension_numbers<[1], [0], [0], [1], [0, 0, 1, 1], [], []>} : vector<28x128xf32>, vector<128x256xf32>, vector<28x256xf32> -> vector<28x256xf32>
    %13 = arith.addf %8, %12 : vector<28x256xf32>
    %c3 = arith.constant 3 : index
    %c0_14 = arith.constant 0 : index
    %14 = vector.load %arg1[%c3, %c0_14] : memref<32x128xf32, #tpu.memory_space<vmem>>, vector<28x128xf32>
    %c3_15 = arith.constant 3 : index
    %c0_16 = arith.constant 0 : index
    %c0_17 = arith.constant 0 : index
    %15 = vector.load %arg2[%c3_15, %c0_16, %c0_17] : memref<5x128x256xf32, #tpu.memory_space<vmem>>, vector<1x128x256xf32>
    %16 = vector.shape_cast %15 : vector<1x128x256xf32> to vector<128x256xf32>
    %cst_18 = arith.constant dense<0.000000e+00> : vector<28x256xf32>
    %17 = tpu.matmul %14, %16, %cst_18 {dimension_numbers = #tpu.dot_dimension_numbers<[1], [0], [0], [1], [0, 0, 1, 1], [], []>} : vector<28x128xf32>, vector<128x256xf32>, vector<28x256xf32> -> vector<28x256xf32>
    %18 = arith.addf %13, %17 : vector<28x256xf32>
    %c4 = arith.constant 4 : index
    %c0_19 = arith.constant 0 : index
    %19 = vector.load %arg1[%c4, %c0_19] : memref<32x128xf32, #tpu.memory_space<vmem>>, vector<28x128xf32>
    %c4_20 = arith.constant 4 : index
    %c0_21 = arith.constant 0 : index
    %c0_22 = arith.constant 0 : index
    %20 = vector.load %arg2[%c4_20, %c0_21, %c0_22] : memref<5x128x256xf32, #tpu.memory_space<vmem>>, vector<1x128x256xf32>
    %21 = vector.shape_cast %20 : vector<1x128x256xf32> to vector<128x256xf32>
    %cst_23 = arith.constant dense<0.000000e+00> : vector<28x256xf32>
    %22 = tpu.matmul %19, %21, %cst_23 {dimension_numbers = #tpu.dot_dimension_numbers<[1], [0], [0], [1], [0, 0, 1, 1], [], []>} : vector<28x128xf32>, vector<128x256xf32>, vector<28x256xf32> -> vector<28x256xf32>
    %23 = arith.addf %18, %22 : vector<28x256xf32>
    %24 = vector.extract_strided_slice %23 {offsets = [0, 0], sizes = [28, 128], strides = [1, 1]} : vector<28x256xf32> to vector<28x128xf32>
    %25 = vector.extract_strided_slice %23 {offsets = [0, 128], sizes = [28, 128], strides = [1, 1]} : vector<28x256xf32> to vector<28x128xf32>
    %26 = arith.maximumf %24, %25 : vector<28x128xf32>
    %c0_24 = arith.constant 0 : index
    %c0_25 = arith.constant 0 : index
    %27 = vector.load %arg13[%c0_24, %c0_25] : memref<32x128xf32, #tpu.memory_space<vmem>>, vector<28x128xf32>
    tpu.vector_store %arg13[%c0_24, %c0_25], %26 {strides = array<i32>} : memref<32x128xf32, #tpu.memory_space<vmem>>, vector<28x128xf32>,
    %c0_26 = arith.constant 0 : index
    %c0_27 = arith.constant 0 : index
    %28 = tpu.strided_load %arg13[%c0_26, %c0_27] {strides = array<i32: 2, 1>} : memref<32x128xf32, #tpu.memory_space<vmem>>, vector<14x128xf32>
    %c1_28 = arith.constant 1 : index
    %c0_29 = arith.constant 0 : index
    %29 = tpu.strided_load %arg13[%c1_28, %c0_29] {strides = array<i32: 2, 1>} : memref<32x128xf32, #tpu.memory_space<vmem>>, vector<14x128xf32>
    %30 = arith.maximumf %28, %29 : vector<14x128xf32>
    %c0_30 = arith.constant 0 : index
    %c0_31 = arith.constant 0 : index
    %31 = vector.load %arg3[%c0_30, %c0_31] : memref<1x128xf32, #tpu.memory_space<vmem>>, vector<1x128xf32>
    %32 = vector.broadcast %31 : vector<1x128xf32> to vector<14x128xf32>
    %33 = arith.addf %30, %32 : vector<14x128xf32>
    %cst_32 = arith.constant 0.000000e+00 : f32
    %34 = vector.broadcast %cst_32 : f32 to vector<14x128xf32>
    %35 = arith.maximumf %33, %34 : vector<14x128xf32>
    %c0_33 = arith.constant 0 : index
    %c0_34 = arith.constant 0 : index
    %36 = vector.load %arg14[%c0_33, %c0_34] : memref<16x128xf32, #tpu.memory_space<vmem>>, vector<14x128xf32>
    tpu.vector_store %arg14[%c0_33, %c0_34], %35 {strides = array<i32>} : memref<16x128xf32, #tpu.memory_space<vmem>>, vector<14x128xf32>,
    %c0_35 = arith.constant 0 : index
    %c0_36 = arith.constant 0 : index
    %37 = vector.load %arg14[%c0_35, %c0_36] : memref<16x128xf32, #tpu.memory_space<vmem>>, vector<10x128xf32>
    %c0_37 = arith.constant 0 : index
    %c0_38 = arith.constant 0 : index
    %c0_39 = arith.constant 0 : index
    %38 = vector.load %arg4[%c0_37, %c0_38, %c0_39] : memref<5x128x256xf32, #tpu.memory_space<vmem>>, vector<1x128x256xf32>
    %39 = vector.shape_cast %38 : vector<1x128x256xf32> to vector<128x256xf32>
    %cst_40 = arith.constant dense<0.000000e+00> : vector<10x256xf32>
    %40 = tpu.matmul %37, %39, %cst_40 {dimension_numbers = #tpu.dot_dimension_numbers<[1], [0], [0], [1], [0, 0, 1, 1], [], []>} : vector<10x128xf32>, vector<128x256xf32>, vector<10x256xf32> -> vector<10x256xf32>
    %c1_41 = arith.constant 1 : index
    %c0_42 = arith.constant 0 : index
    %41 = vector.load %arg14[%c1_41, %c0_42] : memref<16x128xf32, #tpu.memory_space<vmem>>, vector<10x128xf32>
    %c1_43 = arith.constant 1 : index
    %c0_44 = arith.constant 0 : index
    %c0_45 = arith.constant 0 : index
    %42 = vector.load %arg4[%c1_43, %c0_44, %c0_45] : memref<5x128x256xf32, #tpu.memory_space<vmem>>, vector<1x128x256xf32>
    %43 = vector.shape_cast %42 : vector<1x128x256xf32> to vector<128x256xf32>
    %cst_46 = arith.constant dense<0.000000e+00> : vector<10x256xf32>
    %44 = tpu.matmul %41, %43, %cst_46 {dimension_numbers = #tpu.dot_dimension_numbers<[1], [0], [0], [1], [0, 0, 1, 1], [], []>} : vector<10x128xf32>, vector<128x256xf32>, vector<10x256xf32> -> vector<10x256xf32>
    %45 = arith.addf %40, %44 : vector<10x256xf32>
    %c2_47 = arith.constant 2 : index
    %c0_48 = arith.constant 0 : index
    %46 = vector.load %arg14[%c2_47, %c0_48] : memref<16x128xf32, #tpu.memory_space<vmem>>, vector<10x128xf32>
    %c2_49 = arith.constant 2 : index
    %c0_50 = arith.constant 0 : index
    %c0_51 = arith.constant 0 : index
    %47 = vector.load %arg4[%c2_49, %c0_50, %c0_51] : memref<5x128x256xf32, #tpu.memory_space<vmem>>, vector<1x128x256xf32>
    %48 = vector.shape_cast %47 : vector<1x128x256xf32> to vector<128x256xf32>
    %cst_52 = arith.constant dense<0.000000e+00> : vector<10x256xf32>
    %49 = tpu.matmul %46, %48, %cst_52 {dimension_numbers = #tpu.dot_dimension_numbers<[1], [0], [0], [1], [0, 0, 1, 1], [], []>} : vector<10x128xf32>, vector<128x256xf32>, vector<10x256xf32> -> vector<10x256xf32>
    %50 = arith.addf %45, %49 : vector<10x256xf32>
    %c3_53 = arith.constant 3 : index
    %c0_54 = arith.constant 0 : index
    %51 = vector.load %arg14[%c3_53, %c0_54] : memref<16x128xf32, #tpu.memory_space<vmem>>, vector<10x128xf32>
    %c3_55 = arith.constant 3 : index
    %c0_56 = arith.constant 0 : index
    %c0_57 = arith.constant 0 : index
    %52 = vector.load %arg4[%c3_55, %c0_56, %c0_57] : memref<5x128x256xf32, #tpu.memory_space<vmem>>, vector<1x128x256xf32>
    %53 = vector.shape_cast %52 : vector<1x128x256xf32> to vector<128x256xf32>
    %cst_58 = arith.constant dense<0.000000e+00> : vector<10x256xf32>
    %54 = tpu.matmul %51, %53, %cst_58 {dimension_numbers = #tpu.dot_dimension_numbers<[1], [0], [0], [1], [0, 0, 1, 1], [], []>} : vector<10x128xf32>, vector<128x256xf32>, vector<10x256xf32> -> vector<10x256xf32>
    %55 = arith.addf %50, %54 : vector<10x256xf32>
    %c4_59 = arith.constant 4 : index
    %c0_60 = arith.constant 0 : index
    %56 = vector.load %arg14[%c4_59, %c0_60] : memref<16x128xf32, #tpu.memory_space<vmem>>, vector<10x128xf32>
    %c4_61 = arith.constant 4 : index
    %c0_62 = arith.constant 0 : index
    %c0_63 = arith.constant 0 : index
    %57 = vector.load %arg4[%c4_61, %c0_62, %c0_63] : memref<5x128x256xf32, #tpu.memory_space<vmem>>, vector<1x128x256xf32>
    %58 = vector.shape_cast %57 : vector<1x128x256xf32> to vector<128x256xf32>
    %cst_64 = arith.constant dense<0.000000e+00> : vector<10x256xf32>
    %59 = tpu.matmul %56, %58, %cst_64 {dimension_numbers = #tpu.dot_dimension_numbers<[1], [0], [0], [1], [0, 0, 1, 1], [], []>} : vector<10x128xf32>, vector<128x256xf32>, vector<10x256xf32> -> vector<10x256xf32>
    %60 = arith.addf %55, %59 : vector<10x256xf32>
    %61 = vector.extract_strided_slice %60 {offsets = [0, 0], sizes = [10, 128], strides = [1, 1]} : vector<10x256xf32> to vector<10x128xf32>
    %62 = vector.extract_strided_slice %60 {offsets = [0, 128], sizes = [10, 128], strides = [1, 1]} : vector<10x256xf32> to vector<10x128xf32>
    %63 = arith.maximumf %61, %62 : vector<10x128xf32>
    %c0_65 = arith.constant 0 : index
    %c0_66 = arith.constant 0 : index
    %64 = vector.load %arg15[%c0_65, %c0_66] : memref<16x128xf32, #tpu.memory_space<vmem>>, vector<10x128xf32>
    tpu.vector_store %arg15[%c0_65, %c0_66], %63 {strides = array<i32>} : memref<16x128xf32, #tpu.memory_space<vmem>>, vector<10x128xf32>,
    %c0_67 = arith.constant 0 : index
    %c0_68 = arith.constant 0 : index
    %65 = tpu.strided_load %arg15[%c0_67, %c0_68] {strides = array<i32: 2, 1>} : memref<16x128xf32, #tpu.memory_space<vmem>>, vector<5x128xf32>
    %c1_69 = arith.constant 1 : index
    %c0_70 = arith.constant 0 : index
    %66 = tpu.strided_load %arg15[%c1_69, %c0_70] {strides = array<i32: 2, 1>} : memref<16x128xf32, #tpu.memory_space<vmem>>, vector<5x128xf32>
    %67 = arith.maximumf %65, %66 : vector<5x128xf32>
    %c0_71 = arith.constant 0 : index
    %c0_72 = arith.constant 0 : index
    %68 = vector.load %arg5[%c0_71, %c0_72] : memref<1x128xf32, #tpu.memory_space<vmem>>, vector<1x128xf32>
    %69 = vector.broadcast %68 : vector<1x128xf32> to vector<5x128xf32>
    %70 = arith.addf %67, %69 : vector<5x128xf32>
    %cst_73 = arith.constant 0.000000e+00 : f32
    %71 = vector.broadcast %cst_73 : f32 to vector<5x128xf32>
    %72 = arith.maximumf %70, %71 : vector<5x128xf32>
    %73 = vector.extract_strided_slice %72 {offsets = [0, 0], sizes = [1, 128], strides = [1, 1]} : vector<5x128xf32> to vector<1x128xf32>
    %c0_74 = arith.constant 0 : index
    %c0_75 = arith.constant 0 : index
    %c0_76 = arith.constant 0 : index
    %74 = vector.load %arg6[%c0_74, %c0_75, %c0_76] : memref<5x128x120xf32, #tpu.memory_space<vmem>>, vector<1x128x120xf32>
    %75 = vector.shape_cast %74 : vector<1x128x120xf32> to vector<128x120xf32>
    %cst_77 = arith.constant dense<0.000000e+00> : vector<1x120xf32>
    %76 = tpu.matmul %73, %75, %cst_77 {dimension_numbers = #tpu.dot_dimension_numbers<[1], [0], [0], [1], [0, 0, 1, 1], [], []>} : vector<1x128xf32>, vector<128x120xf32>, vector<1x120xf32> -> vector<1x120xf32>
    %77 = vector.extract_strided_slice %72 {offsets = [1, 0], sizes = [1, 128], strides = [1, 1]} : vector<5x128xf32> to vector<1x128xf32>
    %c1_78 = arith.constant 1 : index
    %c0_79 = arith.constant 0 : index
    %c0_80 = arith.constant 0 : index
    %78 = vector.load %arg6[%c1_78, %c0_79, %c0_80] : memref<5x128x120xf32, #tpu.memory_space<vmem>>, vector<1x128x120xf32>
    %79 = vector.shape_cast %78 : vector<1x128x120xf32> to vector<128x120xf32>
    %cst_81 = arith.constant dense<0.000000e+00> : vector<1x120xf32>
    %80 = tpu.matmul %77, %79, %cst_81 {dimension_numbers = #tpu.dot_dimension_numbers<[1], [0], [0], [1], [0, 0, 1, 1], [], []>} : vector<1x128xf32>, vector<128x120xf32>, vector<1x120xf32> -> vector<1x120xf32>
    %81 = arith.addf %76, %80 : vector<1x120xf32>
    %82 = vector.extract_strided_slice %72 {offsets = [2, 0], sizes = [1, 128], strides = [1, 1]} : vector<5x128xf32> to vector<1x128xf32>
    %c2_82 = arith.constant 2 : index
    %c0_83 = arith.constant 0 : index
    %c0_84 = arith.constant 0 : index
    %83 = vector.load %arg6[%c2_82, %c0_83, %c0_84] : memref<5x128x120xf32, #tpu.memory_space<vmem>>, vector<1x128x120xf32>
    %84 = vector.shape_cast %83 : vector<1x128x120xf32> to vector<128x120xf32>
    %cst_85 = arith.constant dense<0.000000e+00> : vector<1x120xf32>
    %85 = tpu.matmul %82, %84, %cst_85 {dimension_numbers = #tpu.dot_dimension_numbers<[1], [0], [0], [1], [0, 0, 1, 1], [], []>} : vector<1x128xf32>, vector<128x120xf32>, vector<1x120xf32> -> vector<1x120xf32>
    %86 = arith.addf %81, %85 : vector<1x120xf32>
    %87 = vector.extract_strided_slice %72 {offsets = [3, 0], sizes = [1, 128], strides = [1, 1]} : vector<5x128xf32> to vector<1x128xf32>
    %c3_86 = arith.constant 3 : index
    %c0_87 = arith.constant 0 : index
    %c0_88 = arith.constant 0 : index
    %88 = vector.load %arg6[%c3_86, %c0_87, %c0_88] : memref<5x128x120xf32, #tpu.memory_space<vmem>>, vector<1x128x120xf32>
    %89 = vector.shape_cast %88 : vector<1x128x120xf32> to vector<128x120xf32>
    %cst_89 = arith.constant dense<0.000000e+00> : vector<1x120xf32>
    %90 = tpu.matmul %87, %89, %cst_89 {dimension_numbers = #tpu.dot_dimension_numbers<[1], [0], [0], [1], [0, 0, 1, 1], [], []>} : vector<1x128xf32>, vector<128x120xf32>, vector<1x120xf32> -> vector<1x120xf32>
    %91 = arith.addf %86, %90 : vector<1x120xf32>
    %92 = vector.extract_strided_slice %72 {offsets = [4, 0], sizes = [1, 128], strides = [1, 1]} : vector<5x128xf32> to vector<1x128xf32>
    %c4_90 = arith.constant 4 : index
    %c0_91 = arith.constant 0 : index
    %c0_92 = arith.constant 0 : index
    %93 = vector.load %arg6[%c4_90, %c0_91, %c0_92] : memref<5x128x120xf32, #tpu.memory_space<vmem>>, vector<1x128x120xf32>
    %94 = vector.shape_cast %93 : vector<1x128x120xf32> to vector<128x120xf32>
    %cst_93 = arith.constant dense<0.000000e+00> : vector<1x120xf32>
    %95 = tpu.matmul %92, %94, %cst_93 {dimension_numbers = #tpu.dot_dimension_numbers<[1], [0], [0], [1], [0, 0, 1, 1], [], []>} : vector<1x128xf32>, vector<128x120xf32>, vector<1x120xf32> -> vector<1x120xf32>
    %96 = arith.addf %91, %95 : vector<1x120xf32>
    %c0_94 = arith.constant 0 : index
    %c0_95 = arith.constant 0 : index
    %97 = vector.load %arg7[%c0_94, %c0_95] : memref<1x120xf32, #tpu.memory_space<vmem>>, vector<1x120xf32>
    %98 = arith.addf %96, %97 : vector<1x120xf32>
    %cst_96 = arith.constant 0.000000e+00 : f32
    %99 = vector.broadcast %cst_96 : f32 to vector<1x120xf32>
    %100 = arith.maximumf %98, %99 : vector<1x120xf32>
    %c0_97 = arith.constant 0 : index
    %c0_98 = arith.constant 0 : index
    %101 = vector.load %arg8[%c0_97, %c0_98] : memref<120x84xf32, #tpu.memory_space<vmem>>, vector<120x84xf32>
    %cst_99 = arith.constant dense<0.000000e+00> : vector<1x84xf32>
    %102 = tpu.matmul %100, %101, %cst_99 {dimension_numbers = #tpu.dot_dimension_numbers<[1], [0], [0], [1], [0, 0, 1, 1], [], []>} : vector<1x120xf32>, vector<120x84xf32>, vector<1x84xf32> -> vector<1x84xf32>
    %c0_100 = arith.constant 0 : index
    %c0_101 = arith.constant 0 : index
    %103 = vector.load %arg9[%c0_100, %c0_101] : memref<1x84xf32, #tpu.memory_space<vmem>>, vector<1x84xf32>
    %104 = arith.addf %102, %103 : vector<1x84xf32>
    %cst_102 = arith.constant 0.000000e+00 : f32
    %105 = vector.broadcast %cst_102 : f32 to vector<1x84xf32>
    %106 = arith.maximumf %104, %105 : vector<1x84xf32>
    %c0_103 = arith.constant 0 : index
    %c0_104 = arith.constant 0 : index
    %107 = vector.load %arg10[%c0_103, %c0_104] : memref<84x10xf32, #tpu.memory_space<vmem>>, vector<84x10xf32>
    %cst_105 = arith.constant dense<0.000000e+00> : vector<1x10xf32>
    %108 = tpu.matmul %106, %107, %cst_105 {dimension_numbers = #tpu.dot_dimension_numbers<[1], [0], [0], [1], [0, 0, 1, 1], [], []>} : vector<1x84xf32>, vector<84x10xf32>, vector<1x10xf32> -> vector<1x10xf32>
    %c0_106 = arith.constant 0 : index
    %c0_107 = arith.constant 0 : index
    %109 = vector.load %arg11[%c0_106, %c0_107] : memref<1x10xf32, #tpu.memory_space<vmem>>, vector<1x10xf32>
    %110 = arith.addf %108, %109 : vector<1x10xf32>
    %c0_108 = arith.constant 0 : index
    %c0_109 = arith.constant 0 : index
    %c0_110 = arith.constant 0 : index
    %111 = vector.load %arg12[%c0_108, %c0_109, %c0_110] : memref<1x1x10xf32, #tpu.memory_space<vmem>>, vector<1x1x10xf32>
    %112 = vector.shape_cast %111 : vector<1x1x10xf32> to vector<1x10xf32>
    %113 = vector.shape_cast %110 : vector<1x10xf32> to vector<1x1x10xf32>
    tpu.vector_store %arg12[%c0_108, %c0_109, %c0_110], %113 {strides = array<i32>} : memref<1x1x10xf32, #tpu.memory_space<vmem>>, vector<1x1x10xf32>,
    return
  }
  func.func @transform_0(%arg0: i32) -> (i32, i32) {
    %c0_i32 = arith.constant 0 : i32
    %c0_i32_0 = arith.constant 0 : i32
    return %arg0, %c0_i32 : i32, i32
  }
  func.func @transform_1(%arg0: i32) -> (i32, i32, i32) {
    %c0_i32 = arith.constant 0 : i32
    %c0_i32_0 = arith.constant 0 : i32
    %c0_i32_1 = arith.constant 0 : i32
    %c0_i32_2 = arith.constant 0 : i32
    return %c0_i32, %c0_i32_0, %c0_i32_1 : i32, i32, i32
  }
  func.func @transform_2(%arg0: i32) -> (i32, i32) {
    %c0_i32 = arith.constant 0 : i32
    %c0_i32_0 = arith.constant 0 : i32
    %c0_i32_1 = arith.constant 0 : i32
    return %c0_i32, %c0_i32_0 : i32, i32
  }
  func.func @transform_3(%arg0: i32) -> (i32, i32, i32) {
    %c0_i32 = arith.constant 0 : i32
    %c0_i32_0 = arith.constant 0 : i32
    %c0_i32_1 = arith.constant 0 : i32
    %c0_i32_2 = arith.constant 0 : i32
    return %c0_i32, %c0_i32_0, %c0_i32_1 : i32, i32, i32
  }
  func.func @transform_4(%arg0: i32) -> (i32, i32) {
    %c0_i32 = arith.constant 0 : i32
    %c0_i32_0 = arith.constant 0 : i32
    %c0_i32_1 = arith.constant 0 : i32
    return %c0_i32, %c0_i32_0 : i32, i32
  }
  func.func @transform_5(%arg0: i32) -> (i32, i32, i32) {
    %c0_i32 = arith.constant 0 : i32
    %c0_i32_0 = arith.constant 0 : i32
    %c0_i32_1 = arith.constant 0 : i32
    %c0_i32_2 = arith.constant 0 : i32
    return %c0_i32, %c0_i32_0, %c0_i32_1 : i32, i32, i32
  }
  func.func @transform_6(%arg0: i32) -> (i32, i32) {
    %c0_i32 = arith.constant 0 : i32
    %c0_i32_0 = arith.constant 0 : i32
    %c0_i32_1 = arith.constant 0 : i32
    return %c0_i32, %c0_i32_0 : i32, i32
  }
  func.func @transform_7(%arg0: i32) -> (i32, i32) {
    %c0_i32 = arith.constant 0 : i32
    %c0_i32_0 = arith.constant 0 : i32
    %c0_i32_1 = arith.constant 0 : i32
    return %c0_i32, %c0_i32_0 : i32, i32
  }
  func.func @transform_8(%arg0: i32) -> (i32, i32) {
    %c0_i32 = arith.constant 0 : i32
    %c0_i32_0 = arith.constant 0 : i32
    %c0_i32_1 = arith.constant 0 : i32
    return %c0_i32, %c0_i32_0 : i32, i32
  }
  func.func @transform_9(%arg0: i32) -> (i32, i32) {
    %c0_i32 = arith.constant 0 : i32
    %c0_i32_0 = arith.constant 0 : i32
    %c0_i32_1 = arith.constant 0 : i32
    return %c0_i32, %c0_i32_0 : i32, i32
  }
  func.func @transform_10(%arg0: i32) -> (i32, i32) {
    %c0_i32 = arith.constant 0 : i32
    %c0_i32_0 = arith.constant 0 : i32
    %c0_i32_1 = arith.constant 0 : i32
    return %c0_i32, %c0_i32_0 : i32, i32
  }
  func.func @transform_11(%arg0: i32) -> (i32, i32, i32) {
    %c0_i32 = arith.constant 0 : i32
    %c0_i32_0 = arith.constant 0 : i32
    %c0_i32_1 = arith.constant 0 : i32
    return %arg0, %c0_i32, %c0_i32_0 : i32, i32, i32
  }
}

</mosaic_0001>

<bundles_post_ra>
// kernel: lenet_forward.1
= control target key start
LH: loop header
LB: loop body
LE: loop exit
PB: predicated region body
PF: predicated region fallthrough
CT: control target
= control target key end

     0   :  { %s3172_s0 = inlined_call_operand.vmem [shape: f32[64,128], index: 0, kind: input, shape index: {}]   ;;  %s3173_s1 = inlined_call_operand.vmem [shape: f32[5,128,256], index: 1, kind: input, shape index: {}]   ;;  %s3174_s2 = inlined_call_operand.vmem [shape: f32[1,128], index: 2, kind: input, shape index: {}]   ;;  %s3175_s3 = inlined_call_operand.hbm [shape: f32[5,128,256], index: 3, kind: input, shape index: {}]   ;;  %s3176_s4 = inlined_call_operand.vmem [shape: f32[1,128], index: 4, kind: input, shape index: {}]   ;;  %s3177_s5 = inlined_call_operand.vmem [shape: f32[5,128,120], index: 5, kind: input, shape index: {}]   ;;  %s3178_s6 = inlined_call_operand.vmem [shape: f32[1,120], index: 6, kind: input, shape index: {}]   ;;  %s3179_s7 = inlined_call_operand.vmem [shape: f32[120,84], index: 7, kind: input, shape index: {}]   ;;  %s3180_s8 = inlined_call_operand.vmem [shape: f32[1,84], index: 8, kind: input, shape index: {}]   ;;  %s3181_s9 = inlined_call_operand.vmem [shape: f32[84,10], index: 9, kind: input, shape index: {}]   ;;  %s3182_s10 = inlined_call_operand.vmem [shape: f32[1,10], index: 10, kind: input, shape index: {}]   ;;  %s3183_s11 = inlined_call_operand.hbm [shape: f32[2,1,10], index: 11, kind: output, shape index: {}]  }
   0x1   :  { %3184 = sst [smem:[#allocation12_spill]] %s3175_s3 }
   0x2   :  { %16 = vsyncpa [#allocation6], 0 }
   0x3   :  { %17 = vsyncpa [#allocation7], 0 }
   0x4   :  { %19 = vsyncpa [#allocation7 + $0x1], 0  ;;  %s2140_s17 = smov 0   ;;  %s2142_s18 = smov 0  }
   0x5   :  { %s2144_s19 = smov 0   ;;  %s2146_s20 = smov 0  }
   0x6 LB: > { %s2161_s21 = sadd.s32 4294967295, %s2075_s20   ;;  %s1720_s22 = sadd.s32 4294967294, %s2075_s20   ;;  %s2075_s20 = sphi %s2146_s20, %s3196_s20   ;;  %s2071_s19 = sphi %s2144_s19, %s3195_s19   ;;  %s2067_s18 = sphi %s2142_s18, %s3194_s18   ;;  %s2063_s17 = sphi %s2140_s17, %s3193_s17  }
   0x7   : > { %s2165_s23 = sadd.s32 1, %s2075_s20   ;;  %s268_s24 = sadd.s32 1, %s2071_s19 }
   0x8   : > { %s265_s25 = ssub.s32 %s2075_s20, %s2165_s23  ;;  %p278_p0 = scmp.ne.s32.totalorder %s2071_s19, %s2067_s18 }
   0x9   : > { %p266_p1 = scmp.eq.s32.totalorder %s265_s25, 0  ;;  %p279_p2 = scmp.eq.s32.totalorder %s2161_s21, 1 }
   0xa   : > { %p284_p3 = scmp.ne.s32.totalorder %s2067_s18, %s2063_s17  ;;  %p285_p4 = scmp.eq.s32.totalorder %s1720_s22, 1 }
   0xb   : > { %s2176_s26 = scalar_select %p266_p1, %s2071_s19, %s268_s24  }
   0xc   : > { %p2178_p5 = por %p279_p2, %p278_p0  ;;  %p2182_p6 = por %p285_p4, %p284_p3 }
   0xd   : > { %3185 = sst [smem:[#allocation11_spill]] %s2176_s26  ;;  %p1721_p7 = scmp.ge.s32.totalorder %s2075_s20, 1 }
   0xe   : > { %p292_p8 = scmp.lt.s32.totalorder %s2075_s20, 3  ;;  %p1939_p9 = scmp.eq.s32.totalorder %s2161_s21, 0 }
   0xf   : > { %s3188_s3 = sld [smem:[#allocation12_spill]]  ;;  %s2077_s13 = smov [#allocation5]  }
  0x10   : > { %p293_p10 = pnand %p1721_p7, %p292_p8  ;;  %s311_s14 = sshll.u32 %s2077_s13, 4  ;;  %s312_s14 = int_to_ptr.vmem [resolvable:$true] %s311_s14 }
  0x11   : > { %s2078_s15 = smov 256   ;;  %s2079_s16 = smov 16  }
  0x12   : > { %p1931_p11 = pneg %p293_p10  ;;  %357 = sbr.rel (%p293_p10) target bundleno = 913 (0x391), region = 64 }
  0x14   : > { %p1932_p12 = pnand %p1939_p9, %p1931_p11 }
  0x15   : > { %s309_s12 = sshll.u32 %s3188_s3, 4  ;;  %s310_s12 = int_to_ptr.hbm [resolvable:$true] %s309_s12 }
  0x16   : > { %1934 = dma.hbm_to_vmem [thread:$0]  (!%p1932_p12), %s310_s12, 20480, %s312_s14, [#allocation6], %s2078_s15, %s2078_s15, %s2079_s16  }
  0x17   : > { %2054 = dma.done.wait (%p1939_p9), [#allocation6], 20480  }
  0x18   : > { %2056 = vsyncadd (%p1939_p9), [#allocation6], 4294946816  ;;  %v1758_v0 = vld [vmem:[%s3173_s1 + $0x1f0] sm:$0xff]  ;;  %v1759_v1 = vld [vmem:[%s3173_s1 + $0x1f8] sm:$0xff]  ;;  %s3189_s14 = sshll.u32 %s2161_s21, 2  ;;  %s3191_s13 = sshll.u32 %s2161_s21, 2 }
  0x19   : > { %v437_v2 = vld [vmem:[%s3173_s1 + $0xf0] sm:$0xff]  ;;  %476 = vmatpush.msra.mxu0 %v1758_v0  ;;  %505 = vmatpush.msra.mxu1 %v1759_v1  ;;  %v438_v3 = vld [vmem:[%s3173_s1 + $0xf8] sm:$0xff]  ;;  %v1756_v4 = vld [vmem:[%s3173_s1 + $0x1e0] sm:$0xff]  ;;  %p2315_p13 = scmp.lt.s32.totalorder %s3189_s14, 7  ;;  %vm1614_vm0 = vcmask 1043456   ;;  %vm1573_vm1 = vcmask 982016   ;;  %s1649_s25 = scalar_lea.hbm %s3183_s11, %s2161_s21 }
  0x1a   : > { %v1757_v5 = vld [vmem:[%s3173_s1 + $0x1e8] sm:$0xff]  ;;  %534 = vmatpush.msra.mxu2 %v437_v2  ;;  %563 = vmatpush.msra.mxu3 %v438_v3  ;;  %v435_v6 = vld [vmem:[%s3173_s1 + $0xe0] sm:$0xff]  ;;  %v1754_v8 = vld [vmem:[%s3173_s1 + $0x1d0] sm:$0xff]  ;;  %vm1610_vm2 = vcmask 687104   ;;  %s395_s24 = sand.u32 1, %s2067_s18   ;;  %vm1638_vm3 = vcmask 73728  }
  0x1b   : > { %v436_v7 = vld [vmem:[%s3173_s1 + $0xe8] sm:$0xff]  ;;  %477 = vmatpush.msra.mxu0 %v1756_v4  ;;  %506 = vmatpush.msra.mxu1 %v1757_v5  ;;  %v1755_v9 = vld [vmem:[%s3173_s1 + $0x1d8] sm:$0xff]  ;;  %v433_v10 = vld [vmem:[%s3173_s1 + $0xd0] sm:$0xff]  ;;  %s3198_s13 = smov (!%p2315_p13, %s3191_s13), 7  ;;  %s396_s12 = scalar_lea.vmem [#allocation8], %s395_s24 }
  0x1c   : > { %v434_v11 = vld [vmem:[%s3173_s1 + $0xd8] sm:$0xff]  ;;  %535 = vmatpush.msra.mxu2 %v435_v6  ;;  %564 = vmatpush.msra.mxu3 %v436_v7  ;;  %v1752_v12 = vld [vmem:[%s3173_s1 + $0x1c0] sm:$0xff]  ;;  %v1753_v13 = vld [vmem:[%s3173_s1 + $0x1c8] sm:$0xff]  ;;  %s1727_s15 = sshll.u32 %s3198_s13, 3  ;;  %s1651_s14 = sshll.u32 %s396_s12, 4  ;;  %s1652_s14 = int_to_ptr.vmem [resolvable:$true] %s1651_s14 }
  0x1d   : > { %478 = vmatpush.msra.mxu0 %v1754_v8  ;;  %507 = vmatpush.msra.mxu1 %v1755_v9  ;;  %v431_v14 = vld [vmem:[%s3173_s1 + $0xc0] sm:$0xff]  ;;  %v432_v15 = vld [vmem:[%s3173_s1 + $0xc8] sm:$0xff]  ;;  %v1750_v16 = vld [vmem:[%s3173_s1 + $0x1b0] sm:$0xff]  ;;  %s2395_s26 = scalar_lea.vmem %s3172_s0, %s1727_s15  ;;  %s1641_s16 = scalar_lea.sflag [#allocation7], %s395_s24 }
  0x1e   : > { %536 = vmatpush.msra.mxu2 %v433_v10  ;;  %565 = vmatpush.msra.mxu3 %v434_v11  ;;  %v1751_v17 = vld [vmem:[%s3173_s1 + $0x1b8] sm:$0xff]  ;;  %v429_v18 = vld [vmem:[%s3173_s1 + $0xb0] sm:$0xff]  ;;  %v1748_v20 = vld [vmem:[%s3173_s1 + $0x1a0] sm:$0xff]  ;;  %s2029_s30 = scalar_lea.hbm %s3183_s11, 2 }
  0x1f   : > { %479 = vmatpush.msra.mxu0 %v1752_v12  ;;  %508 = vmatpush.msra.mxu1 %v1753_v13  ;;  %v430_v19 = vld [vmem:[%s3173_s1 + $0xb8] sm:$0xff]  ;;  %v1749_v21 = vld [vmem:[%s3173_s1 + $0x1a8] sm:$0xff]  ;;  %v427_v22 = vld [vmem:[%s3173_s1 + $0xa0] sm:$0xff] }
  0x20   : > { %537 = vmatpush.msra.mxu2 %v431_v14  ;;  %566 = vmatpush.msra.mxu3 %v432_v15  ;;  %v428_v23 = vld [vmem:[%s3173_s1 + $0xa8] sm:$0xff]  ;;  %v1746_v24 = vld [vmem:[%s3173_s1 + $0x190] sm:$0xff]  ;;  %v1747_v25 = vld [vmem:[%s3173_s1 + $0x198] sm:$0xff] }
  0x21   : > { %480 = vmatpush.msra.mxu0 %v1750_v16  ;;  %509 = vmatpush.msra.mxu1 %v1751_v17  ;;  %v425_v26 = vld [vmem:[%s3173_s1 + $0x90] sm:$0xff]  ;;  %v426_v27 = vld [vmem:[%s3173_s1 + $0x98] sm:$0xff]  ;;  %v1744_v28 = vld [vmem:[%s3173_s1 + $0x180] sm:$0xff] }
  0x22   : > { %538 = vmatpush.msra.mxu2 %v429_v18  ;;  %567 = vmatpush.msra.mxu3 %v430_v19  ;;  %v1745_v29 = vld [vmem:[%s3173_s1 + $0x188] sm:$0xff]  ;;  %v423_v30 = vld [vmem:[%s3173_s1 + $0x80] sm:$0xff]  ;;  %v1742_v32 = vld [vmem:[%s3173_s1 + $0x170] sm:$0xff] }
  0x23   : > { %481 = vmatpush.msra.mxu0 %v1748_v20  ;;  %510 = vmatpush.msra.mxu1 %v1749_v21  ;;  %v424_v31 = vld [vmem:[%s3173_s1 + $0x88] sm:$0xff]  ;;  %v1743_v33 = vld [vmem:[%s3173_s1 + $0x178] sm:$0xff]  ;;  %v421_v34 = vld [vmem:[%s3173_s1 + $0x70] sm:$0xff] }
  0x24   : > { %539 = vmatpush.msra.mxu2 %v427_v22  ;;  %568 = vmatpush.msra.mxu3 %v428_v23  ;;  %v422_v35 = vld [vmem:[%s3173_s1 + $0x78] sm:$0xff]  ;;  %v1740_v36 = vld [vmem:[%s3173_s1 + $0x160] sm:$0xff]  ;;  %v1741_v37 = vld [vmem:[%s3173_s1 + $0x168] sm:$0xff] }
  0x25   : > { %482 = vmatpush.msra.mxu0 %v1746_v24  ;;  %511 = vmatpush.msra.mxu1 %v1747_v25  ;;  %v419_v38 = vld [vmem:[%s3173_s1 + $0x60] sm:$0xff]  ;;  %v420_v39 = vld [vmem:[%s3173_s1 + $0x68] sm:$0xff]  ;;  %v1738_v40 = vld [vmem:[%s3173_s1 + $0x150] sm:$0xff] }
  0x26   : > { %540 = vmatpush.msra.mxu2 %v425_v26  ;;  %569 = vmatpush.msra.mxu3 %v426_v27  ;;  %v1739_v41 = vld [vmem:[%s3173_s1 + $0x158] sm:$0xff]  ;;  %v417_v42 = vld [vmem:[%s3173_s1 + $0x50] sm:$0xff]  ;;  %v1736_v44 = vld [vmem:[%s3173_s1 + $0x140] sm:$0xff] }
  0x27   : > { %483 = vmatpush.msra.mxu0 %v1744_v28  ;;  %512 = vmatpush.msra.mxu1 %v1745_v29  ;;  %v418_v43 = vld [vmem:[%s3173_s1 + $0x58] sm:$0xff]  ;;  %v1737_v45 = vld [vmem:[%s3173_s1 + $0x148] sm:$0xff]  ;;  %v415_v46 = vld [vmem:[%s3173_s1 + $0x40] sm:$0xff] }
  0x28   : > { %541 = vmatpush.msra.mxu2 %v423_v30  ;;  %570 = vmatpush.msra.mxu3 %v424_v31  ;;  %v416_v47 = vld [vmem:[%s3173_s1 + $0x48] sm:$0xff]  ;;  %v1734_v48 = vld [vmem:[%s3173_s1 + $0x130] sm:$0xff]  ;;  %v1735_v49 = vld [vmem:[%s3173_s1 + $0x138] sm:$0xff] }
  0x29   : > { %484 = vmatpush.msra.mxu0 %v1742_v32  ;;  %513 = vmatpush.msra.mxu1 %v1743_v33  ;;  %v413_v50 = vld [vmem:[%s3173_s1 + $0x30] sm:$0xff]  ;;  %v414_v51 = vld [vmem:[%s3173_s1 + $0x38] sm:$0xff]  ;;  %v1732_v52 = vld [vmem:[%s3173_s1 + $0x120] sm:$0xff] }
  0x2a   : > { %542 = vmatpush.msra.mxu2 %v421_v34  ;;  %571 = vmatpush.msra.mxu3 %v422_v35  ;;  %v1733_v53 = vld [vmem:[%s3173_s1 + $0x128] sm:$0xff]  ;;  %v411_v54 = vld [vmem:[%s3173_s1 + $0x20] sm:$0xff]  ;;  %v1730_v56 = vld [vmem:[%s3173_s1 + $0x110] sm:$0xff] }
  0x2b   : > { %485 = vmatpush.msra.mxu0 %v1740_v36  ;;  %514 = vmatpush.msra.mxu1 %v1741_v37  ;;  %v412_v55 = vld [vmem:[%s3173_s1 + $0x28] sm:$0xff]  ;;  %v1731_v57 = vld [vmem:[%s3173_s1 + $0x118] sm:$0xff]  ;;  %v409_v58 = vld [vmem:[%s3173_s1 + $0x10] sm:$0xff] }
  0x2c   : > { %543 = vmatpush.msra.mxu2 %v419_v38  ;;  %572 = vmatpush.msra.mxu3 %v420_v39  ;;  %v410_v59 = vld [vmem:[%s3173_s1 + $0x18] sm:$0xff]  ;;  %v1728_v60 = vld [vmem:[%s3173_s1 + $0x100] sm:$0xff]  ;;  %v1729_v61 = vld [vmem:[%s3173_s1 + $0x108] sm:$0xff] }
  0x2d   : > { %486 = vmatpush.msra.mxu0 %v1738_v40  ;;  %515 = vmatpush.msra.mxu1 %v1739_v41  ;;  %v407_v62 = vld [vmem:[%s3173_s1] sm:$0xff]  ;;  %v408_v63 = vld [vmem:[%s3173_s1 + $0x8] sm:$0xff]  ;;  %v1790_v2 = vld [vmem:[%s3173_s1 + $0x2f0] sm:$0xff] }
  0x2e   : > { %544 = vmatpush.msra.mxu2 %v417_v42  ;;  %573 = vmatpush.msra.mxu3 %v418_v43  ;;  %v439_v0 = vld [vmem:[%s2395_s26 + $0x1] sm:$0xff]  ;;  %v1791_v3 = vld [vmem:[%s3173_s1 + $0x2f8] sm:$0xff]  ;;  %v1822_v4 = vld [vmem:[%s3173_s1 + $0x3f0] sm:$0xff] }
  0x2f   : > { %487 = vmatpush.msra.mxu0 %v1736_v44  ;;  %516 = vmatpush.msra.mxu1 %v1737_v45  ;;  %v403_v1 = vld [vmem:[%s2395_s26] sm:$0xff]  ;;  %v1823_v5 = vld [vmem:[%s3173_s1 + $0x3f8] sm:$0xff]  ;;  %v1789_v7 = vld [vmem:[%s3173_s1 + $0x2e8] sm:$0xff] }
  0x30   : > { %545 = vmatpush.msra.mxu2 %v415_v46  ;;  %574 = vmatpush.msra.mxu3 %v416_v47  ;;  %v1788_v6 = vld [vmem:[%s3173_s1 + $0x2e0] sm:$0xff]  ;;  %v1821_v9 = vld [vmem:[%s3173_s1 + $0x3e8] sm:$0xff]  ;;  %v1786_v10 = vld [vmem:[%s3173_s1 + $0x2d0] sm:$0xff] }
  0x31   : > { %488 = vmatpush.msra.mxu0 %v1734_v48  ;;  %517 = vmatpush.msra.mxu1 %v1735_v49  ;;  %v1820_v8 = vld [vmem:[%s3173_s1 + $0x3e0] sm:$0xff]  ;;  %v1787_v11 = vld [vmem:[%s3173_s1 + $0x2d8] sm:$0xff]  ;;  %v1818_v12 = vld [vmem:[%s3173_s1 + $0x3d0] sm:$0xff] }
  0x32   : > { %546 = vmatpush.msra.mxu2 %v413_v50  ;;  %575 = vmatpush.msra.mxu3 %v414_v51  ;;  %v1819_v13 = vld [vmem:[%s3173_s1 + $0x3d8] sm:$0xff]  ;;  %v1784_v14 = vld [vmem:[%s3173_s1 + $0x2c0] sm:$0xff]  ;;  %v1785_v15 = vld [vmem:[%s3173_s1 + $0x2c8] sm:$0xff] }
  0x33   : > { %489 = vmatpush.msra.mxu0 %v1732_v52  ;;  %518 = vmatpush.msra.mxu1 %v1733_v53  ;;  %v1816_v16 = vld [vmem:[%s3173_s1 + $0x3c0] sm:$0xff]  ;;  %v1817_v17 = vld [vmem:[%s3173_s1 + $0x3c8] sm:$0xff]  ;;  %v1782_v20 = vld [vmem:[%s3173_s1 + $0x2b0] sm:$0xff] }
  0x34   : > { %547 = vmatpush.msra.mxu2 %v411_v54  ;;  %576 = vmatpush.msra.mxu3 %v412_v55  ;;  %v440_v18 = vld [vmem:[%s2395_s26 + $0x9] sm:$0xff]  ;;  %v1783_v21 = vld [vmem:[%s3173_s1 + $0x2b8] sm:$0xff]  ;;  %v1780_v24 = vld [vmem:[%s3173_s1 + $0x2a0] sm:$0xff] }
  0x35   : > { %490 = vmatpush.msra.mxu0 %v1730_v56  ;;  %519 = vmatpush.msra.mxu1 %v1731_v57  ;;  %v404_v19 = vld [vmem:[%s2395_s26 + $0x8] sm:$0xff]  ;;  %v1814_v22 = vld [vmem:[%s3173_s1 + $0x3b0] sm:$0xff]  ;;  %v1815_v23 = vld [vmem:[%s3173_s1 + $0x3b8] sm:$0xff] }
  0x36   : > { %548 = vmatpush.msra.mxu2 %v409_v58  ;;  %577 = vmatpush.msra.mxu3 %v410_v59  ;;  %v1781_v25 = vld [vmem:[%s3173_s1 + $0x2a8] sm:$0xff]  ;;  %v1812_v26 = vld [vmem:[%s3173_s1 + $0x3a0] sm:$0xff]  ;;  %v1778_v28 = vld [vmem:[%s3173_s1 + $0x290] sm:$0xff] }
  0x37   : > { %491 = vmatpush.msra.mxu0 %v1728_v60  ;;  %520 = vmatpush.msra.mxu1 %v1729_v61  ;;  %v1813_v27 = vld [vmem:[%s3173_s1 + $0x3a8] sm:$0xff]  ;;  %v1779_v29 = vld [vmem:[%s3173_s1 + $0x298] sm:$0xff]  ;;  %v1810_v30 = vld [vmem:[%s3173_s1 + $0x390] sm:$0xff] }
  0x38   : > { %549 = vmatpush.msra.mxu2 %v407_v62  ;;  %578 = vmatpush.msra.mxu3 %v408_v63  ;;  %v1811_v31 = vld [vmem:[%s3173_s1 + $0x398] sm:$0xff]  ;;  %v1776_v32 = vld [vmem:[%s3173_s1 + $0x280] sm:$0xff]  ;;  %v1777_v33 = vld [vmem:[%s3173_s1 + $0x288] sm:$0xff] }
  0x39   : > { %492 = vmatmul.f32.vlgmr.msra.gmra.mxu0 %v439_v0  ;;  %521 = vmatmul.f32.vlgmr.msra.gmra.mxu1 %v439_v0  ;;  %v1808_v34 = vld [vmem:[%s3173_s1 + $0x380] sm:$0xff]  ;;  %v1809_v35 = vld [vmem:[%s3173_s1 + $0x388] sm:$0xff]  ;;  %v441_v36 = vld [vmem:[%s2395_s26 + $0x11] sm:$0xff] }
  0x3a   : > { %550 = vmatmul.f32.vlgmr.msra.gmra.mxu2 %v403_v1  ;;  %579 = vmatmul.f32.vlgmr.msra.gmra.mxu3 %v403_v1  ;;  %v405_v37 = vld [vmem:[%s2395_s26 + $0x10] sm:$0xff]  ;;  %v1775_v39 = vld [vmem:[%s3173_s1 + $0x278] sm:$0xff]  ;;  %v1772_v42 = vld [vmem:[%s3173_s1 + $0x260] sm:$0xff] }
  0x3b   : > { %629 = vmatpush.msrb.mxu0 %v1790_v2  ;;  %658 = vmatpush.msrb.mxu1 %v1791_v3  ;;  %v1774_v38 = vld [vmem:[%s3173_s1 + $0x270] sm:$0xff]  ;;  %v1807_v41 = vld [vmem:[%s3173_s1 + $0x378] sm:$0xff]  ;;  %v1773_v43 = vld [vmem:[%s3173_s1 + $0x268] sm:$0xff] }
  0x3c   : > { %732 = vmatpush.msrb.mxu2 %v1822_v4  ;;  %761 = vmatpush.msrb.mxu3 %v1823_v5  ;;  %v1806_v40 = vld [vmem:[%s3173_s1 + $0x370] sm:$0xff]  ;;  %v1804_v44 = vld [vmem:[%s3173_s1 + $0x360] sm:$0xff]  ;;  %v1805_v45 = vld [vmem:[%s3173_s1 + $0x368] sm:$0xff] }
  0x3d   : > { %630 = vmatpush.msrb.mxu0 %v1788_v6  ;;  %659 = vmatpush.msrb.mxu1 %v1789_v7  ;;  %v1770_v46 = vld [vmem:[%s3173_s1 + $0x250] sm:$0xff]  ;;  %v1771_v47 = vld [vmem:[%s3173_s1 + $0x258] sm:$0xff]  ;;  %v1768_v50 = vld [vmem:[%s3173_s1 + $0x240] sm:$0xff] }
  0x3e   : > { %733 = vmatpush.msrb.mxu2 %v1820_v8  ;;  %762 = vmatpush.msrb.mxu3 %v1821_v9  ;;  %v1802_v48 = vld [vmem:[%s3173_s1 + $0x350] sm:$0xff]  ;;  %v1803_v49 = vld [vmem:[%s3173_s1 + $0x358] sm:$0xff]  ;;  %v1769_v51 = vld [vmem:[%s3173_s1 + $0x248] sm:$0xff] }
  0x3f   : > { %631 = vmatpush.msrb.mxu0 %v1786_v10  ;;  %660 = vmatpush.msrb.mxu1 %v1787_v11  ;;  %v1800_v52 = vld [vmem:[%s3173_s1 + $0x340] sm:$0xff]  ;;  %v1801_v53 = vld [vmem:[%s3173_s1 + $0x348] sm:$0xff]  ;;  %v442_v54 = vld [vmem:[%s2395_s26 + $0x19] sm:$0xf] }
  0x40   : > { %734 = vmatpush.msrb.mxu2 %v1818_v12  ;;  %763 = vmatpush.msrb.mxu3 %v1819_v13  ;;  %v406_v55 = vld [vmem:[%s2395_s26 + $0x18] sm:$0xf]  ;;  %v1766_v56 = vld [vmem:[%s3173_s1 + $0x230] sm:$0xff]  ;;  %v1764_v60 = vld [vmem:[%s3173_s1 + $0x220] sm:$0xff] }
  0x41   : > { %632 = vmatpush.msrb.mxu0 %v1784_v14  ;;  %661 = vmatpush.msrb.mxu1 %v1785_v15  ;;  %v1767_v57 = vld [vmem:[%s3173_s1 + $0x238] sm:$0xff]  ;;  %v1798_v58 = vld [vmem:[%s3173_s1 + $0x330] sm:$0xff]  ;;  %v1765_v61 = vld [vmem:[%s3173_s1 + $0x228] sm:$0xff] }
  0x42   : > { %735 = vmatpush.msrb.mxu2 %v1816_v16  ;;  %764 = vmatpush.msrb.mxu3 %v1817_v17  ;;  %v1799_v59 = vld [vmem:[%s3173_s1 + $0x338] sm:$0xff]  ;;  %v1796_v62 = vld [vmem:[%s3173_s1 + $0x320] sm:$0xff]  ;;  %v1797_v63 = vld [vmem:[%s3173_s1 + $0x328] sm:$0xff] }
  0x43   : > { %495 = vmatmul.f32.gmra.mxu0 %v440_v18  ;;  %524 = vmatmul.f32.gmra.mxu1 %v440_v18  ;;  %v1762_v0 = vld [vmem:[%s3173_s1 + $0x210] sm:$0xff]  ;;  %v1763_v1 = vld [vmem:[%s3173_s1 + $0x218] sm:$0xff]  ;;  %v1760_v4 = vld [vmem:[%s3173_s1 + $0x200] sm:$0xff] }
  0x44   : > { %553 = vmatmul.f32.gmra.mxu2 %v404_v19  ;;  %582 = vmatmul.f32.gmra.mxu3 %v404_v19  ;;  %v1794_v2 = vld [vmem:[%s3173_s1 + $0x310] sm:$0xff]  ;;  %v1795_v3 = vld [vmem:[%s3173_s1 + $0x318] sm:$0xff]  ;;  %v1761_v5 = vld [vmem:[%s3173_s1 + $0x208] sm:$0xff] }
  0x45   : > { %633 = vmatpush.msrb.mxu0 %v1782_v20  ;;  %662 = vmatpush.msrb.mxu1 %v1783_v21  ;;  %v1792_v6 = vld [vmem:[%s3173_s1 + $0x300] sm:$0xff]  ;;  %v1793_v7 = vld [vmem:[%s3173_s1 + $0x308] sm:$0xff]  ;;  %v1854_v10 = vld [vmem:[%s3173_s1 + $0x4f0] sm:$0xff] }
  0x46   : > { %736 = vmatpush.msrb.mxu2 %v1814_v22  ;;  %765 = vmatpush.msrb.mxu3 %v1815_v23  ;;  %v592_v8 = vld [vmem:[%s2395_s26 + $0x2] sm:$0xff]  ;;  %v1855_v11 = vld [vmem:[%s3173_s1 + $0x4f8] sm:$0xff]  ;;  %v1850_v14 = vld [vmem:[%s3173_s1 + $0x4d0] sm:$0xff] }
  0x47   : > { %634 = vmatpush.msrb.mxu0 %v1780_v24  ;;  %663 = vmatpush.msrb.mxu1 %v1781_v25  ;;  %v695_v9 = vld [vmem:[%s2395_s26 + $0x3] sm:$0xff]  ;;  %v1851_v15 = vld [vmem:[%s3173_s1 + $0x4d8] sm:$0xff]  ;;  %v696_v19 = vld [vmem:[%s2395_s26 + $0xb] sm:$0xff] }
  0x48   : > { %737 = vmatpush.msrb.mxu2 %v1812_v26  ;;  %766 = vmatpush.msrb.mxu3 %v1813_v27  ;;  %v1852_v12 = vld [vmem:[%s3173_s1 + $0x4e0] sm:$0xff]  ;;  %v1853_v13 = vld [vmem:[%s3173_s1 + $0x4e8] sm:$0xff]  ;;  %v1846_v20 = vld [vmem:[%s3173_s1 + $0x4b0] sm:$0xff] }
  0x49   : > { %635 = vmatpush.msrb.mxu0 %v1778_v28  ;;  %664 = vmatpush.msrb.mxu1 %v1779_v29  ;;  %v1848_v16 = vld [vmem:[%s3173_s1 + $0x4c0] sm:$0xff]  ;;  %v1849_v17 = vld [vmem:[%s3173_s1 + $0x4c8] sm:$0xff]  ;;  %v1847_v21 = vld [vmem:[%s3173_s1 + $0x4b8] sm:$0xff] }
  0x4a   : > { %738 = vmatpush.msrb.mxu2 %v1810_v30  ;;  %767 = vmatpush.msrb.mxu3 %v1811_v31  ;;  %v593_v18 = vld [vmem:[%s2395_s26 + $0xa] sm:$0xff]  ;;  %v1844_v22 = vld [vmem:[%s3173_s1 + $0x4a0] sm:$0xff]  ;;  %v1843_v25 = vld [vmem:[%s3173_s1 + $0x498] sm:$0xff] }
  0x4b   : > { %636 = vmatpush.msrb.mxu0 %v1776_v32  ;;  %665 = vmatpush.msrb.mxu1 %v1777_v33  ;;  %v1845_v23 = vld [vmem:[%s3173_s1 + $0x4a8] sm:$0xff]  ;;  %v1842_v24 = vld [vmem:[%s3173_s1 + $0x490] sm:$0xff]  ;;  %v1840_v26 = vld [vmem:[%s3173_s1 + $0x480] sm:$0xff] }
  0x4c   : > { %739 = vmatpush.msrb.mxu2 %v1808_v34  ;;  %768 = vmatpush.msrb.mxu3 %v1809_v35  ;;  %v1841_v27 = vld [vmem:[%s3173_s1 + $0x488] sm:$0xff]  ;;  %v594_v28 = vld [vmem:[%s2395_s26 + $0x12] sm:$0xff]  ;;  %v1836_v32 = vld [vmem:[%s3173_s1 + $0x460] sm:$0xff] }
  0x4d   : > { %498 = vmatmul.f32.gmra.mxu0 %v441_v36  ;;  %527 = vmatmul.f32.gmra.mxu1 %v441_v36  ;;  %v697_v29 = vld [vmem:[%s2395_s26 + $0x13] sm:$0xff]  ;;  %v1837_v33 = vld [vmem:[%s3173_s1 + $0x468] sm:$0xff]  ;;  %v1832_v36 = vld [vmem:[%s3173_s1 + $0x440] sm:$0xff] }
  0x4e   : > { %556 = vmatmul.f32.gmra.mxu2 %v405_v37  ;;  %585 = vmatmul.f32.gmra.mxu3 %v405_v37  ;;  %v1838_v30 = vld [vmem:[%s3173_s1 + $0x470] sm:$0xff]  ;;  %v1839_v31 = vld [vmem:[%s3173_s1 + $0x478] sm:$0xff]  ;;  %v1833_v37 = vld [vmem:[%s3173_s1 + $0x448] sm:$0xff] }
  0x4f   : > { %637 = vmatpush.msrb.mxu0 %v1774_v38  ;;  %666 = vmatpush.msrb.mxu1 %v1775_v39  ;;  %v1834_v34 = vld [vmem:[%s3173_s1 + $0x450] sm:$0xff]  ;;  %v1835_v35 = vld [vmem:[%s3173_s1 + $0x458] sm:$0xff] }
  0x50   : > { %740 = vmatpush.msrb.mxu2 %v1806_v40  ;;  %769 = vmatpush.msrb.mxu3 %v1807_v41  ;;  %v595_v38 = vld [vmem:[%s2395_s26 + $0x1a] sm:$0xf]  ;;  %v1830_v40 = vld [vmem:[%s3173_s1 + $0x430] sm:$0xff] }
  0x51   : > { %638 = vmatpush.msrb.mxu0 %v1772_v42  ;;  %667 = vmatpush.msrb.mxu1 %v1773_v43  ;;  %v698_v39 = vld [vmem:[%s2395_s26 + $0x1b] sm:$0xf]  ;;  %v1828_v42 = vld [vmem:[%s3173_s1 + $0x420] sm:$0xff]  ;;  %v1829_v43 = vld [vmem:[%s3173_s1 + $0x428] sm:$0xff] }
  0x52   : > { %741 = vmatpush.msrb.mxu2 %v1804_v44  ;;  %770 = vmatpush.msrb.mxu3 %v1805_v45  ;;  %v1831_v41 = vld [vmem:[%s3173_s1 + $0x438] sm:$0xff]  ;;  %v1826_v44 = vld [vmem:[%s3173_s1 + $0x410] sm:$0xff] }
  0x53   : > { %639 = vmatpush.msrb.mxu0 %v1770_v46  ;;  %668 = vmatpush.msrb.mxu1 %v1771_v47  ;;  %v1827_v45 = vld [vmem:[%s3173_s1 + $0x418] sm:$0xff]  ;;  %v1824_v46 = vld [vmem:[%s3173_s1 + $0x400] sm:$0xff]  ;;  %v1825_v47 = vld [vmem:[%s3173_s1 + $0x408] sm:$0xff] }
  0x54   : > { %742 = vmatpush.msrb.mxu2 %v1802_v48  ;;  %771 = vmatpush.msrb.mxu3 %v1803_v49  ;;  %v798_v48 = vld [vmem:[%s2395_s26 + $0x4] sm:$0xff]  ;;  %v799_v49 = vld [vmem:[%s2395_s26 + $0xc] sm:$0xff] }
  0x55   : > { %640 = vmatpush.msrb.mxu0 %v1768_v50  ;;  %669 = vmatpush.msrb.mxu1 %v1769_v51  ;;  %v800_v50 = vld [vmem:[%s2395_s26 + $0x14] sm:$0xff]  ;;  %v801_v51 = vld [vmem:[%s2395_s26 + $0x1c] sm:$0xf]  ;;  %s1653_s26 = sshll.u32 %s1649_s25, 4  ;;  %s1654_s26 = int_to_ptr.hbm [resolvable:$true] %s1653_s26 }
  0x56   : > { %743 = vmatpush.msrb.mxu2 %v1800_v52  ;;  %772 = vmatpush.msrb.mxu3 %v1801_v53  ;;  %s2023_s22 = sshra.s32 %s1654_s26, 4  ;;  %s2024_s22 = int_to_ptr.hbm [resolvable:$true] %s2023_s22 }
  0x57   : > { %501 = vmatmul.f32.gmra.mxu0 %v442_v54  ;;  %530 = vmatmul.f32.gmra.mxu1 %v442_v54  ;;  %s2025_s13 = scalar_lea.hbm %s2024_s22, 1  ;;  %p2030_p3 = scmp.lt.s32.totalorder %s2024_s22, %s3183_s11 }
  0x58   : > { %559 = vmatmul.f32.gmra.mxu2 %v406_v55  ;;  %588 = vmatmul.f32.gmra.mxu3 %v406_v55  ;;  %p2026_p0 = scmp.ne.s32.totalorder %s2024_s22, %s2025_s13  ;;  %p2031_p4 = scmp.lt.s32.totalorder %s2029_s30, %s2025_s13 }
  0x59   : > { %641 = vmatpush.msrb.mxu0 %v1766_v56  ;;  %670 = vmatpush.msrb.mxu1 %v1767_v57 }
  0x5a   : > { %744 = vmatpush.msrb.mxu2 %v1798_v58  ;;  %773 = vmatpush.msrb.mxu3 %v1799_v59  ;;  %p2027_p1 = pnand %p2026_p0, %p2178_p5  ;;  %p2032_p7 = por %p2031_p4, %p2030_p3 }
  0x5b   : > { %642 = vmatpush.msrb.mxu0 %v1764_v60  ;;  %671 = vmatpush.msrb.mxu1 %v1765_v61 }
  0x5c   : > { %745 = vmatpush.msrb.mxu2 %v1796_v62  ;;  %774 = vmatpush.msrb.mxu3 %v1797_v63  ;;  %v995_v62 = vld [vmem:[#allocation5 + $0x1f0] sm:$0xff]  ;;  %v996_v63 = vld [vmem:[#allocation5 + $0x1f8] sm:$0xff]  ;;  %p2028_p2 = pneg %p2027_p1 }
  0x5d   : > { %643 = vmatpush.msrb.mxu0 %v1762_v0  ;;  %672 = vmatpush.msrb.mxu1 %v1763_v1 }
  0x5e   : > { %746 = vmatpush.msrb.mxu2 %v1794_v2  ;;  %775 = vmatpush.msrb.mxu3 %v1795_v3  ;;  %v993_v2 = vld [vmem:[#allocation5 + $0x1e0] sm:$0xff]  ;;  %v994_v3 = vld [vmem:[#allocation5 + $0x1e8] sm:$0xff]  ;;  %p2033_p8 = pnand %p2032_p7, %p2028_p2 }
  0x5f   : > { %644 = vmatpush.msrb.mxu0 %v1760_v4  ;;  %673 = vmatpush.msrb.mxu1 %v1761_v5  ;;  %v991_v4 = vld [vmem:[#allocation5 + $0x1d0] sm:$0xff]  ;;  %v992_v5 = vld [vmem:[#allocation5 + $0x1d8] sm:$0xff] }
  0x60   : > { %747 = vmatpush.msrb.mxu2 %v1792_v6  ;;  %776 = vmatpush.msrb.mxu3 %v1793_v7  ;;  %v989_v6 = vld [vmem:[#allocation5 + $0x1c0] sm:$0xff]  ;;  %v990_v7 = vld [vmem:[#allocation5 + $0x1c8] sm:$0xff] }
  0x61   : > { %645 = vmatmul.f32.vlgmr.msrb.gmra.mxu0 %v592_v8  ;;  %674 = vmatmul.f32.vlgmr.msrb.gmra.mxu1 %v592_v8  ;;  %v960_v8 = vld [vmem:[#allocation5 + $0xf0] sm:$0xff] }
  0x62   : > { %748 = vmatmul.f32.vlgmr.msrb.gmra.mxu2 %v695_v9  ;;  %777 = vmatmul.f32.vlgmr.msrb.gmra.mxu3 %v695_v9  ;;  %v961_v9 = vld [vmem:[#allocation5 + $0xf8] sm:$0xff] }
  0x63   : > { %835 = vmatpush.msra.mxu0 %v1854_v10  ;;  %864 = vmatpush.msra.mxu1 %v1855_v11 }
  0x64   : > { %997 = vmatpush.msra.mxu2 %v995_v62  ;;  %1020 = vmatpush.msra.mxu3 %v996_v63  ;;  %v942_v62 = vld [vmem:[#allocation5 + $0x60] sm:$0xff] }
  0x65   : > { %836 = vmatpush.msra.mxu0 %v1852_v12  ;;  %865 = vmatpush.msra.mxu1 %v1853_v13  ;;  %v987_v12 = vld [vmem:[#allocation5 + $0x1b0] sm:$0xff]  ;;  %v988_v13 = vld [vmem:[#allocation5 + $0x1b8] sm:$0xff] }
  0x66   : > { %998 = vmatpush.msra.mxu2 %v993_v2  ;;  %1021 = vmatpush.msra.mxu3 %v994_v3  ;;  %v943_v3 = vld [vmem:[#allocation5 + $0x68] sm:$0xff] }
  0x67   : > { %837 = vmatpush.msra.mxu0 %v1850_v14  ;;  %866 = vmatpush.msra.mxu1 %v1851_v15  ;;  %v958_v14 = vld [vmem:[#allocation5 + $0xe0] sm:$0xff]  ;;  %v959_v15 = vld [vmem:[#allocation5 + $0xe8] sm:$0xff] }
  0x68   : > { %999 = vmatpush.msra.mxu2 %v991_v4  ;;  %1022 = vmatpush.msra.mxu3 %v992_v5  ;;  %v969_v4 = vld [vmem:[#allocation5 + $0x120] sm:$0xff]  ;;  %v970_v5 = vld [vmem:[#allocation5 + $0x128] sm:$0xff] }
  0x69   : > { %838 = vmatpush.msra.mxu0 %v1848_v16  ;;  %867 = vmatpush.msra.mxu1 %v1849_v17  ;;  %v985_v16 = vld [vmem:[#allocation5 + $0x1a0] sm:$0xff]  ;;  %v986_v17 = vld [vmem:[#allocation5 + $0x1a8] sm:$0xff] }
  0x6a   : > { %648 = vmatmul.f32.gmra.mxu0 %v593_v18  ;;  %677 = vmatmul.f32.gmra.mxu1 %v593_v18  ;;  %v956_v18 = vld [vmem:[#allocation5 + $0xd0] sm:$0xff] }
  0x6b   : > { %751 = vmatmul.f32.gmra.mxu2 %v696_v19  ;;  %780 = vmatmul.f32.gmra.mxu3 %v696_v19  ;;  %v957_v19 = vld [vmem:[#allocation5 + $0xd8] sm:$0xff] }
  0x6c   : > { %839 = vmatpush.msra.mxu0 %v1846_v20  ;;  %868 = vmatpush.msra.mxu1 %v1847_v21 }
  0x6d   : > { %1000 = vmatpush.msra.mxu2 %v989_v6  ;;  %1023 = vmatpush.msra.mxu3 %v990_v7  ;;  %v940_v6 = vld [vmem:[#allocation5 + $0x50] sm:$0xff]  ;;  %v941_v7 = vld [vmem:[#allocation5 + $0x58] sm:$0xff] }
  0x6e   : > { %840 = vmatpush.msra.mxu0 %v1844_v22  ;;  %869 = vmatpush.msra.mxu1 %v1845_v23  ;;  %v983_v22 = vld [vmem:[#allocation5 + $0x190] sm:$0xff]  ;;  %v984_v23 = vld [vmem:[#allocation5 + $0x198] sm:$0xff] }
  0x6f   : > { %1001 = vmatpush.msra.mxu2 %v987_v12  ;;  %1024 = vmatpush.msra.mxu3 %v988_v13  ;;  %v938_v12 = vld [vmem:[#allocation5 + $0x40] sm:$0xff]  ;;  %v939_v13 = vld [vmem:[#allocation5 + $0x48] sm:$0xff] }
  0x70   : > { %841 = vmatpush.msra.mxu0 %v1842_v24  ;;  %870 = vmatpush.msra.mxu1 %v1843_v25  ;;  %v954_v24 = vld [vmem:[#allocation5 + $0xc0] sm:$0xff]  ;;  %v955_v25 = vld [vmem:[#allocation5 + $0xc8] sm:$0xff] }
  0x71   : > { %1002 = vmatpush.msra.mxu2 %v985_v16  ;;  %1025 = vmatpush.msra.mxu3 %v986_v17  ;;  %v936_v16 = vld [vmem:[#allocation5 + $0x30] sm:$0xff]  ;;  %v937_v17 = vld [vmem:[#allocation5 + $0x38] sm:$0xff] }
  0x72   : > { %842 = vmatpush.msra.mxu0 %v1840_v26  ;;  %871 = vmatpush.msra.mxu1 %v1841_v27  ;;  %v981_v26 = vld [vmem:[#allocation5 + $0x180] sm:$0xff]  ;;  %v982_v27 = vld [vmem:[#allocation5 + $0x188] sm:$0xff] }
  0x73   : > { %651 = vmatmul.f32.gmra.mxu0 %v594_v28  ;;  %680 = vmatmul.f32.gmra.mxu1 %v594_v28  ;;  %v952_v28 = vld [vmem:[#allocation5 + $0xb0] sm:$0xff] }
  0x74   : > { %754 = vmatmul.f32.gmra.mxu2 %v697_v29  ;;  %783 = vmatmul.f32.gmra.mxu3 %v697_v29  ;;  %v953_v29 = vld [vmem:[#allocation5 + $0xb8] sm:$0xff] }
  0x75   : > { %843 = vmatpush.msra.mxu0 %v1838_v30  ;;  %872 = vmatpush.msra.mxu1 %v1839_v31 }
  0x76   : > { %1003 = vmatpush.msra.mxu2 %v983_v22  ;;  %1026 = vmatpush.msra.mxu3 %v984_v23 }
  0x77   : > { %844 = vmatpush.msra.mxu0 %v1836_v32  ;;  %873 = vmatpush.msra.mxu1 %v1837_v33  ;;  %v979_v32 = vld [vmem:[#allocation5 + $0x170] sm:$0xff]  ;;  %v980_v33 = vld [vmem:[#allocation5 + $0x178] sm:$0xff] }
  0x78   : > { %1004 = vmatpush.msra.mxu2 %v981_v26  ;;  %1027 = vmatpush.msra.mxu3 %v982_v27  ;;  %v1120_v26 = vld [vmem:[#allocation5 + $0x2e0] sm:$0xff]  ;;  %v1121_v27 = vld [vmem:[#allocation5 + $0x2e8] sm:$0xff] }
  0x79   : > { %845 = vmatpush.msra.mxu0 %v1834_v34  ;;  %874 = vmatpush.msra.mxu1 %v1835_v35  ;;  %v950_v34 = vld [vmem:[#allocation5 + $0xa0] sm:$0xff]  ;;  %v951_v35 = vld [vmem:[#allocation5 + $0xa8] sm:$0xff] }
  0x7a   : > { %1005 = vmatpush.msra.mxu2 %v979_v32  ;;  %1028 = vmatpush.msra.mxu3 %v980_v33  ;;  %v932_v32 = vld [vmem:[#allocation5 + $0x10] sm:$0xff]  ;;  %v933_v33 = vld [vmem:[#allocation5 + $0x18] sm:$0xff] }
  0x7b   : > { %846 = vmatpush.msra.mxu0 %v1832_v36  ;;  %875 = vmatpush.msra.mxu1 %v1833_v37  ;;  %v977_v36 = vld [vmem:[#allocation5 + $0x160] sm:$0xff]  ;;  %v978_v37 = vld [vmem:[#allocation5 + $0x168] sm:$0xff] }
  0x7c   : > { %654 = vmatmul.f32.gmra.mxu0 %v595_v38  ;;  %683 = vmatmul.f32.gmra.mxu1 %v595_v38  ;;  %v948_v38 = vld [vmem:[#allocation5 + $0x90] sm:$0xff] }
  0x7d   : > { %757 = vmatmul.f32.gmra.mxu2 %v698_v39  ;;  %786 = vmatmul.f32.gmra.mxu3 %v698_v39  ;;  %v949_v39 = vld [vmem:[#allocation5 + $0x98] sm:$0xff] }
  0x7e   : > { %847 = vmatpush.msra.mxu0 %v1830_v40  ;;  %876 = vmatpush.msra.mxu1 %v1831_v41  ;;  %v975_v40 = vld [vmem:[#allocation5 + $0x150] sm:$0xff]  ;;  %v976_v41 = vld [vmem:[#allocation5 + $0x158] sm:$0xff] }
  0x7f   : > { %1006 = vmatpush.msra.mxu2 %v977_v36  ;;  %1029 = vmatpush.msra.mxu3 %v978_v37  ;;  %v930_v36 = vld [vmem:[#allocation5] sm:$0xff]  ;;  %v931_v37 = vld [vmem:[#allocation5 + $0x8] sm:$0xff] }
  0x80   : > { %848 = vmatpush.msra.mxu0 %v1828_v42  ;;  %877 = vmatpush.msra.mxu1 %v1829_v43  ;;  %v946_v42 = vld [vmem:[#allocation5 + $0x80] sm:$0xff]  ;;  %v947_v43 = vld [vmem:[#allocation5 + $0x88] sm:$0xff] }
  0x81   : > { %1007 = vmatpush.msra.mxu2 %v975_v40  ;;  %1030 = vmatpush.msra.mxu3 %v976_v41 }
  0x82   : > { %849 = vmatpush.msra.mxu0 %v1826_v44  ;;  %878 = vmatpush.msra.mxu1 %v1827_v45 }
  0x84   : > { %850 = vmatpush.msra.mxu0 %v1824_v46  ;;  %879 = vmatpush.msra.mxu1 %v1825_v47  ;;  %v973_v46 = vld [vmem:[#allocation5 + $0x140] sm:$0xff]  ;;  %v974_v47 = vld [vmem:[#allocation5 + $0x148] sm:$0xff] }
  0x85   : > { %851 = vmatmul.f32.vlgmr.msra.gmra.mxu0 %v798_v48  ;;  %880 = vmatmul.f32.vlgmr.msra.gmra.mxu1 %v798_v48  ;;  %v944_v48 = vld [vmem:[#allocation5 + $0x70] sm:$0xff] }
  0x86   : > { %1043 = vmatpush.msrb.mxu0 %v960_v8  ;;  %1066 = vmatpush.msrb.mxu1 %v961_v9  ;;  %v967_v8 = vld [vmem:[#allocation5 + $0x110] sm:$0xff]  ;;  %v968_v9 = vld [vmem:[#allocation5 + $0x118] sm:$0xff] }
  0x87   : > { %1008 = vmatpush.msra.mxu2 %v973_v46  ;;  %1031 = vmatpush.msra.mxu3 %v974_v47  ;;  %v1114_v46 = vld [vmem:[#allocation5 + $0x2b0] sm:$0xff]  ;;  %v1115_v47 = vld [vmem:[#allocation5 + $0x2b8] sm:$0xff] }
  0x88   : > { %1044 = vmatpush.msrb.mxu0 %v958_v14  ;;  %1067 = vmatpush.msrb.mxu1 %v959_v15  ;;  %v965_v14 = vld [vmem:[#allocation5 + $0x100] sm:$0xff]  ;;  %v966_v15 = vld [vmem:[#allocation5 + $0x108] sm:$0xff] }
  0x8a   : > { %1045 = vmatpush.msrb.mxu0 %v956_v18  ;;  %1068 = vmatpush.msrb.mxu1 %v957_v19  ;;  %v1122_v18 = vld [vmem:[#allocation5 + $0x2f0] sm:$0xff]  ;;  %v1123_v19 = vld [vmem:[#allocation5 + $0x2f8] sm:$0xff] }
  0x8c   : > { %1046 = vmatpush.msrb.mxu0 %v954_v24  ;;  %1069 = vmatpush.msrb.mxu1 %v955_v25  ;;  %v934_v24 = vld [vmem:[#allocation5 + $0x20] sm:$0xff]  ;;  %v935_v25 = vld [vmem:[#allocation5 + $0x28] sm:$0xff] }
  0x8d   : > { %854 = vmatmul.f32.gmra.mxu0 %v799_v49  ;;  %883 = vmatmul.f32.gmra.mxu1 %v799_v49  ;;  %v945_v49 = vld [vmem:[#allocation5 + $0x78] sm:$0xff] }
  0x8e   : > { %1047 = vmatpush.msrb.mxu0 %v952_v28  ;;  %1070 = vmatpush.msrb.mxu1 %v953_v29 }
  0x90   : > { %1048 = vmatpush.msrb.mxu0 %v950_v34  ;;  %1071 = vmatpush.msrb.mxu1 %v951_v35  ;;  %v1118_v34 = vld [vmem:[#allocation5 + $0x2d0] sm:$0xff]  ;;  %v1119_v35 = vld [vmem:[#allocation5 + $0x2d8] sm:$0xff] }
  0x92   : > { %1049 = vmatpush.msrb.mxu0 %v948_v38  ;;  %1072 = vmatpush.msrb.mxu1 %v949_v39  ;;  %v1116_v38 = vld [vmem:[#allocation5 + $0x2c0] sm:$0xff]  ;;  %v1117_v39 = vld [vmem:[#allocation5 + $0x2c8] sm:$0xff] }
  0x94   : > { %1050 = vmatpush.msrb.mxu0 %v946_v42  ;;  %1073 = vmatpush.msrb.mxu1 %v947_v43  ;;  %v1207_v42 = vld [vmem:[#allocation5 + $0x3f0] sm:$0xff]  ;;  %v1208_v43 = vld [vmem:[#allocation5 + $0x3f8] sm:$0xff] }
  0x95   : > { %857 = vmatmul.f32.gmra.mxu0 %v800_v50  ;;  %886 = vmatmul.f32.gmra.mxu1 %v800_v50  ;;  %v971_v50 = vld [vmem:[#allocation5 + $0x130] sm:$0xff] }
  0x96   : > { %1051 = vmatpush.msrb.mxu0 %v944_v48  ;;  %1074 = vmatpush.msrb.mxu1 %v945_v49 }
  0x97   : > { %1009 = vmatpush.msra.mxu2 %v971_v50  ;;  %v1205_v50 = vld [vmem:[#allocation5 + $0x3e0] sm:$0xff] }
  0x98   : > { %1052 = vmatpush.msrb.mxu0 %v942_v62  ;;  %1075 = vmatpush.msrb.mxu1 %v943_v3 }
  0x99   : > { %1010 = vmatpush.msra.mxu2 %v969_v4  ;;  %v1203_v4 = vld [vmem:[#allocation5 + $0x3d0] sm:$0xff] }
  0x9a   : > { %1053 = vmatpush.msrb.mxu0 %v940_v6  ;;  %1076 = vmatpush.msrb.mxu1 %v941_v7  ;;  %v1111_v7 = vld [vmem:[#allocation5 + $0x298] sm:$0xff] }
  0x9b   : > { %1011 = vmatpush.msra.mxu2 %v967_v8 }
  0x9c   : > { %1054 = vmatpush.msrb.mxu0 %v938_v12  ;;  %1077 = vmatpush.msrb.mxu1 %v939_v13  ;;  %v1201_v12 = vld [vmem:[#allocation5 + $0x3c0] sm:$0xff]  ;;  %v1202_v13 = vld [vmem:[#allocation5 + $0x3c8] sm:$0xff] }
  0x9d   : > { %860 = vmatmul.f32.gmra.mxu0 %v801_v51  ;;  %889 = vmatmul.f32.gmra.mxu1 %v801_v51  ;;  %v972_v51 = vld [vmem:[#allocation5 + $0x138] sm:$0xff] }
  0x9e   : > { %1032 = vmatpush.msra.mxu3 %v972_v51  ;;  %1012 = vmatpush.msra.mxu2 %v965_v14  ;;  %v1206_v51 = vld [vmem:[#allocation5 + $0x3e8] sm:$0xff]  ;;  %v1108_v14 = vld [vmem:[#allocation5 + $0x280] sm:$0xff] }
  0x9f   : > { %1055 = vmatpush.msrb.mxu0 %v936_v16  ;;  %1078 = vmatpush.msrb.mxu1 %v937_v17 }
  0xa0   : > { %1033 = vmatpush.msra.mxu3 %v970_v5  ;;  %1124 = vmatpush.msrb.mxu2 %v1122_v18  ;;  %v1204_v5 = vld [vmem:[#allocation5 + $0x3d8] sm:$0xff] }
  0xa1   : > { %1056 = vmatpush.msrb.mxu0 %v934_v24  ;;  %1079 = vmatpush.msrb.mxu1 %v935_v25  ;;  %v1107_v24 = vld [vmem:[#allocation5 + $0x278] sm:$0xff] }
  0xa2   : > { %1034 = vmatpush.msra.mxu3 %v968_v9  ;;  %1125 = vmatpush.msrb.mxu2 %v1120_v26 }
  0xa3   : > { %1057 = vmatpush.msrb.mxu0 %v932_v32  ;;  %1080 = vmatpush.msrb.mxu1 %v933_v33  ;;  %v1196_v32 = vld [vmem:[#allocation5 + $0x398] sm:$0xff] }
  0xa4   : > { %1035 = vmatpush.msra.mxu3 %v966_v15  ;;  %1126 = vmatpush.msrb.mxu2 %v1118_v34  ;;  %v1109_v15 = vld [vmem:[#allocation5 + $0x288] sm:$0xff] }
  0xa5   : > { %1058 = vmatpush.msrb.mxu0 %v930_v36  ;;  %1081 = vmatpush.msrb.mxu1 %v931_v37  ;;  %v1103_v36 = vld [vmem:[#allocation5 + $0x258] sm:$0xff] }
  0xa6   : > { %1147 = vmatpush.msrb.mxu3 %v1123_v19  ;;  %1127 = vmatpush.msrb.mxu2 %v1116_v38  ;;  %v1199_v19 = vld [vmem:[#allocation5 + $0x3b0] sm:$0xff]  ;;  %v1194_v38 = vld [vmem:[#allocation5 + $0x388] sm:$0xff] }
  0xa7   : > { %1209 = vmatpush.msra.mxu0 %v1207_v42  ;;  %1232 = vmatpush.msra.mxu1 %v1208_v43  ;;  %v1101_v42 = vld [vmem:[#allocation5 + $0x248] sm:$0xff] }
  0xa8   : > { %1148 = vmatpush.msrb.mxu3 %v1121_v27  ;;  %1128 = vmatpush.msrb.mxu2 %v1114_v46  ;;  %v1104_v27 = vld [vmem:[#allocation5 + $0x260] sm:$0xff] }
  0xa9   : > { %1210 = vmatpush.msra.mxu0 %v1205_v50  ;;  %1233 = vmatpush.msra.mxu1 %v1206_v51 }
  0xaa   : > { %1149 = vmatpush.msrb.mxu3 %v1119_v35  ;;  %v1102_v35 = vld [vmem:[#allocation5 + $0x250] sm:$0xff] }
  0xab   : > { %1211 = vmatpush.msra.mxu0 %v1203_v4  ;;  %1234 = vmatpush.msra.mxu1 %v1204_v5 }
  0xac   : > { %1150 = vmatpush.msrb.mxu3 %v1117_v39 }
  0xad   : > { %1212 = vmatpush.msra.mxu0 %v1201_v12  ;;  %1235 = vmatpush.msra.mxu1 %v1202_v13 }
  0xae   : > { %1151 = vmatpush.msrb.mxu3 %v1115_v47  ;;  %v1191_v47 = vld [vmem:[#allocation5 + $0x370] sm:$0xff] }
  0xaf   : > { %1213 = vmatpush.msra.mxu0 %v1199_v19 }
  0xb6   : > { %v2717_v52 = vpop.f32.mrf.mxu0  ;;  %v2719_v53 = vpop.f32.mrf.mxu1 }
  0xbd   : > { %v2729_v58 = vpop.f32.mrf.mxu2  ;;  %v2731_v59 = vpop.f32.mrf.mxu3 }
  0xbe   : > { %v552_v40 = vadd.f32 %v2729_v58, %v2717_v52  ;;  %v581_v41 = vadd.f32 %v2731_v59, %v2719_v53  ;;  %v1112_v52 = vld [vmem:[#allocation5 + $0x2a0] sm:$0xff]  ;;  %v1113_v53 = vld [vmem:[#allocation5 + $0x2a8] sm:$0xff] }
  0xbf   : > { %1129 = vmatpush.msrb.mxu2 %v1112_v52  ;;  %1152 = vmatpush.msrb.mxu3 %v1113_v53  ;;  %v1098_v52 = vld [vmem:[#allocation5 + $0x230] sm:$0xff]  ;;  %v1099_v53 = vld [vmem:[#allocation5 + $0x238] sm:$0xff] }
  0xc0   : > { %v2721_v54 = vpop.f32.mrf.mxu0  ;;  %v2723_v55 = vpop.f32.mrf.mxu1 }
  0xc1   : > { %1153 = vmatpush.msrb.mxu3 %v1111_v7 }
  0xc3   : > { %1154 = vmatpush.msrb.mxu3 %v1109_v15  ;;  %v1977_v15 = vld [vmem:[%s3174_s2] ss:$0 sm:$0xff] }
  0xc5   : > { %1155 = vmatpush.msrb.mxu3 %v1107_v24  ;;  %v1183_v24 = vld [vmem:[#allocation5 + $0x330] sm:$0xff] }
  0xc7   : > { %v2737_v0 = vpop.f32.mrf.mxu2  ;;  %v2739_v1 = vpop.f32.mrf.mxu3 }
  0xc8   : > { %v555_v16 = vadd.f32 %v2737_v0, %v2721_v54  ;;  %v584_v17 = vadd.f32 %v2739_v1, %v2723_v55  ;;  %v1197_v54 = vld [vmem:[#allocation5 + $0x3a0] sm:$0xff]  ;;  %v1198_v0 = vld [vmem:[#allocation5 + $0x3a8] sm:$0xff]  ;;  %v1195_v1 = vld [vmem:[#allocation5 + $0x390] sm:$0xff] }
  0xc9   : > { %v1105_v55 = vld [vmem:[#allocation5 + $0x268] sm:$0xff]  ;;  %1214 = vmatpush.msra.mxu0 %v1197_v54 }
  0xca   : > { %v2725_v56 = vpop.f32.mrf.mxu0  ;;  %v2727_v57 = vpop.f32.mrf.mxu1  ;;  %1156 = vmatpush.msrb.mxu3 %v1105_v55  ;;  %v1179_v55 = vld [vmem:[#allocation5 + $0x310] sm:$0xff] }
  0xcb   : > { %1215 = vmatpush.msra.mxu0 %v1195_v1  ;;  %v1180_v1 = vld [vmem:[#allocation5 + $0x318] sm:$0xff] }
  0xcc   : > { %1157 = vmatpush.msrb.mxu3 %v1103_v36  ;;  %v1178_v36 = vld [vmem:[#allocation5 + $0x308] sm:$0xff] }
  0xce   : > { %1158 = vmatpush.msrb.mxu3 %v1101_v42 }
  0xd0   : > { %1159 = vmatpush.msrb.mxu3 %v1099_v53 }
  0xd1   : > { %v2745_v20 = vpop.f32.mrf.mxu2  ;;  %v2747_v21 = vpop.f32.mrf.mxu3 }
  0xd2   : > { %v587_v50 = vadd.f32 %v2747_v21, %v2727_v57  ;;  %v1187_v57 = vld [vmem:[#allocation5 + $0x350] sm:$0xff]  ;;  %v1188_v21 = vld [vmem:[#allocation5 + $0x358] sm:$0xff] }
  0xd4   : > { %v2733_v60 = vpop.f32.mrf.mxu0  ;;  %v2735_v61 = vpop.f32.mrf.mxu1 }
  0xdb   : > { %v2753_v44 = vpop.f32.mrf.mxu2  ;;  %v2755_v45 = vpop.f32.mrf.mxu3 }
  0xdc   : > { %v561_v12 = vadd.f32 %v2753_v44, %v2733_v60  ;;  %v590_v13 = vadd.f32 %v2755_v45, %v2735_v61  ;;  %v1184_v45 = vld [vmem:[#allocation5 + $0x338] sm:$0xff] }
  0xde   : > { %v2741_v10 = vpop.f32.mrf.mxu0  ;;  %v2743_v11 = vpop.f32.mrf.mxu1 }
  0xdf   : > { %v687_v48 = vadd.f32 %v2741_v10, %v552_v40  ;;  %v688_v49 = vadd.f32 %v2743_v11, %v581_v41  ;;  %v1110_v11 = vld [vmem:[#allocation5 + $0x290] sm:$0xff]  ;;  %v1100_v41 = vld [vmem:[#allocation5 + $0x240] sm:$0xff] }
  0xe0   : > { %1130 = vmatpush.msrb.mxu2 %v1110_v11 }
  0xe2   : > { %1131 = vmatpush.msrb.mxu2 %v1108_v14 }
  0xe5   : > { %v749_v22 = vpop.f32.mrf.mxu2  ;;  %v778_v23 = vpop.f32.mrf.mxu3 }
  0xe6   : > { %v790_v58 = vadd.f32 %v749_v22, %v687_v48  ;;  %v791_v59 = vadd.f32 %v778_v23, %v688_v49  ;;  %v1200_v22 = vld [vmem:[#allocation5 + $0x3b8] sm:$0xff]  ;;  %v1106_v23 = vld [vmem:[#allocation5 + $0x270] sm:$0xff]  ;;  %v558_v49 = vadd.f32 %v2745_v20, %v2725_v56  ;;  %v1096_v56 = vld [vmem:[#allocation5 + $0x220] sm:$0xff] }
  0xe7   : > { %v2749_v30 = vpop.f32.mrf.mxu0  ;;  %v2751_v31 = vpop.f32.mrf.mxu1  ;;  %1236 = vmatpush.msra.mxu1 %v1200_v22  ;;  %1132 = vmatpush.msrb.mxu2 %v1106_v23  ;;  %v1192_v48 = vld [vmem:[#allocation5 + $0x378] sm:$0xff]  ;;  %v1097_v20 = vld [vmem:[#allocation5 + $0x228] sm:$0xff] }
  0xe8   : > { %v689_v25 = vadd.f32 %v2749_v30, %v555_v16  ;;  %v690_v26 = vadd.f32 %v2751_v31, %v584_v17  ;;  %v1193_v31 = vld [vmem:[#allocation5 + $0x380] sm:$0xff]  ;;  %1160 = vmatpush.msrb.mxu3 %v1097_v20  ;;  %v1093_v17 = vld [vmem:[#allocation5 + $0x208] sm:$0xff]  ;;  %v1280_v20 = vld [vmem:[#allocation5 + $0x490] sm:$0xff] }
  0xe9   : > { %1237 = vmatpush.msra.mxu1 %v1198_v0  ;;  %1133 = vmatpush.msrb.mxu2 %v1104_v27  ;;  %v1092_v16 = vld [vmem:[#allocation5 + $0x200] sm:$0xff] }
  0xea   : > { %1216 = vmatpush.msra.mxu0 %v1193_v31 }
  0xeb   : > { %1238 = vmatpush.msra.mxu1 %v1196_v32  ;;  %1134 = vmatpush.msrb.mxu2 %v1102_v35 }
  0xec   : > { %1217 = vmatpush.msra.mxu0 %v1191_v47  ;;  %v1290_v47 = vld [vmem:[#allocation5 + $0x4e0] sm:$0xff] }
  0xed   : > { %1239 = vmatpush.msra.mxu1 %v1194_v38  ;;  %1135 = vmatpush.msrb.mxu2 %v1100_v41  ;;  %v1292_v41 = vld [vmem:[#allocation5 + $0x4f0] sm:$0xff] }
  0xee   : > { %v752_v62 = vpop.f32.mrf.mxu2  ;;  %v781_v3 = vpop.f32.mrf.mxu3 }
  0xef   : > { %v792_v33 = vadd.f32 %v752_v62, %v689_v25  ;;  %v793_v34 = vadd.f32 %v781_v3, %v690_v26  ;;  %1240 = vmatpush.msra.mxu1 %v1192_v48  ;;  %1136 = vmatpush.msrb.mxu2 %v1098_v52  ;;  %v1181_v25 = vld [vmem:[#allocation5 + $0x320] sm:$0xff]  ;;  %v1182_v26 = vld [vmem:[#allocation5 + $0x328] sm:$0xff] }
  0xf0   : > { %v2757_v63 = vpop.f32.mrf.mxu0  ;;  %v2759_v2 = vpop.f32.mrf.mxu1  ;;  %v1291_v48 = vld [vmem:[#allocation5 + $0x4e8] sm:$0xff] }
  0xf1   : > { %v691_v62 = vadd.f32 %v2757_v63, %v558_v49  ;;  %v692_v3 = vadd.f32 %v2759_v2, %v587_v50  ;;  %1137 = vmatpush.msrb.mxu2 %v1096_v56  ;;  %v1185_v63 = vld [vmem:[#allocation5 + $0x340] sm:$0xff]  ;;  %v1186_v2 = vld [vmem:[#allocation5 + $0x348] sm:$0xff]  ;;  %v1288_v49 = vld [vmem:[#allocation5 + $0x4d0] sm:$0xff] }
  0xf2   : > { %v1289_v50 = vld [vmem:[#allocation5 + $0x4d8] sm:$0xff]  ;;  %v1287_v52 = vld [vmem:[#allocation5 + $0x4c8] sm:$0xff] }
  0xf3   : > { %v1283_v56 = vld [vmem:[#allocation5 + $0x4a8] sm:$0xff] }
  0xf7   : > { %v755_v43 = vpop.f32.mrf.mxu2  ;;  %v784_v46 = vpop.f32.mrf.mxu3 }
  0xf8   : > { %v794_v4 = vadd.f32 %v755_v43, %v691_v62  ;;  %v795_v5 = vadd.f32 %v784_v46, %v692_v3  ;;  %v1293_v46 = vld [vmem:[#allocation5 + $0x4f8] sm:$0xff]  ;;  %v1282_v3 = vld [vmem:[#allocation5 + $0x4a0] sm:$0xff] }
  0xf9   : > { %v2761_v28 = vpop.f32.mrf.mxu0  ;;  %v2763_v29 = vpop.f32.mrf.mxu1 }
  0xfa   : > { %v693_v60 = vadd.f32 %v2761_v28, %v561_v12  ;;  %v694_v61 = vadd.f32 %v2763_v29, %v590_v13  ;;  %v1177_v29 = vld [vmem:[#allocation5 + $0x300] sm:$0xff]  ;;  %v1271_v12 = vld [vmem:[#allocation5 + $0x448] sm:$0xff]  ;;  %v1268_v13 = vld [vmem:[#allocation5 + $0x430] sm:$0xff] }
 0x100   : > { %v787_v19 = vpop.f32.mrf.mxu3 }
 0x101   : > { %v797_v0 = vadd.f32 %v787_v19, %v694_v61  ;;  %v1265_v19 = vld [vmem:[#allocation5 + $0x418] sm:$0xff] }
 0x102   : > { %v852_v6 = vpop.f32.mrf.mxu0  ;;  %v881_v10 = vpop.f32.mrf.mxu1  ;;  %v1871_v61 = vld [vmem:[%s3177_s5 + $0xf8] sm:$0xff] }
 0x103   : > { %v893_v8 = vadd.f32 %v852_v6, %v790_v58  ;;  %v894_v9 = vadd.f32 %v881_v10, %v791_v59  ;;  %v1189_v58 = vld [vmem:[#allocation5 + $0x360] sm:$0xff]  ;;  %v1190_v59 = vld [vmem:[#allocation5 + $0x368] sm:$0xff]  ;;  %v1094_v6 = vld [vmem:[#allocation5 + $0x210] sm:$0xff] }
 0x104   : > { %1218 = vmatpush.msra.mxu0 %v1189_v58  ;;  %1241 = vmatpush.msra.mxu1 %v1190_v59  ;;  %v1095_v10 = vld [vmem:[#allocation5 + $0x218] sm:$0xff]  ;;  %v1284_v58 = vld [vmem:[#allocation5 + $0x4b0] sm:$0xff] }
 0x105   : > { %v901_v18 = vmax.f32 %v893_v8, %v894_v9  ;;  %1138 = vmatpush.msrb.mxu2 %v1094_v6  ;;  %1161 = vmatpush.msrb.mxu3 %v1095_v10  ;;  %v1285_v59 = vld [vmem:[#allocation5 + $0x4b8] sm:$0xff]  ;;  %v1276_v6 = vld [vmem:[#allocation5 + $0x470] sm:$0xff] }
 0x106   : > { %1219 = vmatpush.msra.mxu0 %v1187_v57  ;;  %1242 = vmatpush.msra.mxu1 %v1188_v21  ;;  %v1281_v57 = vld [vmem:[#allocation5 + $0x498] sm:$0xff]  ;;  %v1278_v21 = vld [vmem:[#allocation5 + $0x480] sm:$0xff] }
 0x107   : > { %905 = vst [vmem:[#allocation2] sm:$0xff] %v901_v18  ;;  %v758_v18 = vpop.f32.mrf.mxu2  ;;  %1139 = vmatpush.msrb.mxu2 %v1092_v16  ;;  %1162 = vmatpush.msrb.mxu3 %v1093_v17  ;;  %v1277_v10 = vld [vmem:[#allocation5 + $0x478] sm:$0xff]  ;;  %v1266_v16 = vld [vmem:[#allocation5 + $0x420] sm:$0xff]  ;;  %v1267_v17 = vld [vmem:[#allocation5 + $0x428] sm:$0xff] }
 0x108   : > { %1220 = vmatpush.msra.mxu0 %v1185_v63  ;;  %1243 = vmatpush.msra.mxu1 %v1186_v2  ;;  %v796_v54 = vadd.f32 %v758_v18, %v693_v60  ;;  %v1275_v63 = vld [vmem:[#allocation5 + $0x468] sm:$0xff]  ;;  %v1272_v2 = vld [vmem:[#allocation5 + $0x450] sm:$0xff] }
 0x109   : > { %v1264_v18 = vld [vmem:[#allocation5 + $0x410] sm:$0xff] }
 0x10a   : > { %v855_v30 = vpop.f32.mrf.mxu0  ;;  %v884_v37 = vpop.f32.mrf.mxu1  ;;  %1221 = vmatpush.msra.mxu0 %v1183_v24  ;;  %1244 = vmatpush.msra.mxu1 %v1184_v45  ;;  %v1869_v45 = vld [vmem:[%s3177_s5 + $0xe8] sm:$0xff] }
 0x10b   : > { %v895_v39 = vadd.f32 %v855_v30, %v792_v33  ;;  %v896_v40 = vadd.f32 %v884_v37, %v793_v34 }
 0x10c   : > { %1222 = vmatpush.msra.mxu0 %v1181_v25  ;;  %1245 = vmatpush.msra.mxu1 %v1182_v26  ;;  %v1868_v25 = vld [vmem:[%s3177_s5 + $0xe0] sm:$0xff]  ;;  %v1867_v26 = vld [vmem:[%s3177_s5 + $0xd8] sm:$0xff] }
 0x10d   : > { %v902_v51 = vmax.f32 %v895_v39, %v896_v40 }
 0x10e   : > { %1223 = vmatpush.msra.mxu0 %v1179_v55  ;;  %1246 = vmatpush.msra.mxu1 %v1180_v1  ;;  %v1863_v55 = vld [vmem:[%s3177_s5 + $0xb8] sm:$0xff]  ;;  %v1862_v1 = vld [vmem:[%s3177_s5 + $0xb0] sm:$0xff] }
 0x10f   : > { %906 = vst [vmem:[#allocation2 + $0x8] sm:$0xff] %v902_v51  ;;  %v1286_v51 = vld [vmem:[#allocation5 + $0x4c0] sm:$0xff] }
 0x110   : > { %1224 = vmatpush.msra.mxu0 %v1177_v29  ;;  %1247 = vmatpush.msra.mxu1 %v1178_v36  ;;  %v1903_v29 = vld [vmem:[%s3177_s5 + $0x1f8] sm:$0xff] }
 0x111   : > { %v1859_v36 = vld [vmem:[%s3177_s5 + $0x98] sm:$0xff] }
 0x112   : > { %v858_v11 = vpop.f32.mrf.mxu0  ;;  %v887_v7 = vpop.f32.mrf.mxu1 }
 0x113   : > { %v897_v8 = vadd.f32 %v858_v11, %v794_v4  ;;  %v898_v9 = vadd.f32 %v887_v7, %v795_v5  ;;  %v1279_v4 = vld [vmem:[#allocation5 + $0x488] sm:$0xff]  ;;  %v1274_v7 = vld [vmem:[#allocation5 + $0x460] sm:$0xff] }
 0x115   : > { %v903_v14 = vmax.f32 %v897_v8, %v898_v9  ;;  %v1273_v8 = vld [vmem:[#allocation5 + $0x458] sm:$0xff]  ;;  %v1270_v9 = vld [vmem:[#allocation5 + $0x440] sm:$0xff] }
 0x116   : > { %v909_v22 = vld [vmem:[#allocation2] ss:$2 sm:$0xff]  ;;  %v913_v23 = vld [vmem:[#allocation2 + $0x1] ss:$2 sm:$0xff] }
 0x117   : > { %v916_v44 = vmax.f32 %v909_v22, %v913_v23  ;;  %907 = vst [vmem:[#allocation2 + $0x10] sm:$0xff] %v903_v14  ;;  %v1269_v14 = vld [vmem:[#allocation5 + $0x438] sm:$0xff]  ;;  %v1262_v22 = vld [vmem:[#allocation5 + $0x400] sm:$0xff]  ;;  %v1263_v23 = vld [vmem:[#allocation5 + $0x408] sm:$0xff] }
 0x119   : > { %v922_v27 = vadd.f32 %v1977_v15, %v916_v44  ;;  %v1870_v44 = vld [vmem:[%s3177_s5 + $0xf0] sm:$0xff] }
 0x11a   : > { %v861_v32 = vpop.f32.mrf.mxu0  ;;  %v890_v33 = vpop.f32.mrf.mxu1 }
 0x11b   : > { %v899_v34 = vadd.f32 %v861_v32, %v796_v54  ;;  %v900_v28 = vadd.f32 %v890_v33, %v797_v0  ;;  %v924_v35 = vmax.f32 %v922_v27, 0.0  ;;  %v1866_v54 = vld [vmem:[%s3177_s5 + $0xd0] sm:$0xff]  ;;  %v1865_v0 = vld [vmem:[%s3177_s5 + $0xc8] sm:$0xff]  ;;  %v1864_v27 = vld [vmem:[%s3177_s5 + $0xc0] sm:$0xff] }
 0x11c   : > { %v1861_v32 = vld [vmem:[%s3177_s5 + $0xa8] sm:$0xff]  ;;  %v1373_v33 = vld [vmem:[%s3177_s5 + $0x78] sm:$0xff] }
 0x11d   : > { %v904_v30 = vmax.f32 %v899_v34, %v900_v28  ;;  %926 = vst [vmem:[#allocation3] sm:$0xff] %v924_v35  ;;  %1059 = vmatmul.f32.vlgmr.msrb.gmra.mxu0 %v924_v35  ;;  %1082 = vmatmul.f32.vlgmr.msrb.gmra.mxu1 %v924_v35  ;;  %v1860_v34 = vld [vmem:[%s3177_s5 + $0xa0] sm:$0xff]  ;;  %v1372_v28 = vld [vmem:[%s3177_s5 + $0x70] sm:$0xff]  ;;  %v1887_v35 = vld [vmem:[%s3177_s5 + $0x178] sm:$0xff] }
 0x11e   : > { %1394 = vmatpush.msrb.mxu0 %v1871_v61  ;;  %1414 = vmatpush.msrb.mxu1 %v1373_v33  ;;  %v1913_v61 = vld [vmem:[%s3177_s5 + $0x248] sm:$0xff] }
 0x11f   : > { %908 = vst [vmem:[#allocation2 + $0x18] sm:$0xf] %v904_v30  ;;  %v1359_v33 = vld [vmem:[%s3177_s5 + $0x8] sm:$0xff] }
 0x120   : > { %1395 = vmatpush.msrb.mxu0 %v1870_v44  ;;  %1415 = vmatpush.msrb.mxu1 %v1372_v28  ;;  %v1361_v44 = vld [vmem:[%s3177_s5 + $0x18] sm:$0xff]  ;;  %v1890_v28 = vld [vmem:[%s3177_s5 + $0x190] sm:$0xff] }
 0x122   : > { %1396 = vmatpush.msrb.mxu0 %v1869_v45  ;;  %v1876_v45 = vld [vmem:[%s3177_s5 + $0x120] sm:$0xff] }
 0x124   : > { %1397 = vmatpush.msrb.mxu0 %v1868_v25 }
 0x126   : > { %v911_v37 = vld [vmem:[#allocation2 + $0x10] ss:$2 sm:$0x3f]  ;;  %v915_v31 = vld [vmem:[#allocation2 + $0x11] ss:$2 sm:$0x3f]  ;;  %1398 = vmatpush.msrb.mxu0 %v1867_v26 }
 0x127   : > { %v917_v38 = vmax.f32 %v911_v37, %v915_v31  ;;  %v1371_v31 = vld [vmem:[%s3177_s5 + $0x68] sm:$0xff] }
 0x128   : > { %1399 = vmatpush.msrb.mxu0 %v1866_v54  ;;  %1416 = vmatpush.msrb.mxu1 %v1371_v31  ;;  %v1892_v54 = vld [vmem:[%s3177_s5 + $0x1a0] sm:$0xff] }
 0x129   : > { %v923_v39 = vadd.f32 %v1977_v15, %v917_v38  ;;  %v1886_v38 = vld [vmem:[%s3177_s5 + $0x170] sm:$0xff] }
 0x12a   : > { %1400 = vmatpush.msrb.mxu0 %v1865_v0  ;;  %v1912_v0 = vld [vmem:[%s3177_s5 + $0x240] sm:$0xff] }
 0x12b   : > { %v925_v40 = vmax.f32 %v923_v39, 0.0  ;;  %v1902_v39 = vld [vmem:[%s3177_s5 + $0x1f0] sm:$0xff] }
 0x12c   : > { %1401 = vmatpush.msrb.mxu0 %v1864_v27  ;;  %v1360_v27 = vld [vmem:[%s3177_s5 + $0x10] sm:$0xff] }
 0x12d   : > { %927 = vst [vmem:[#allocation3 + $0x8] sm:$0x3f] %v925_v40  ;;  %v1858_v40 = vld [vmem:[%s3177_s5 + $0x90] sm:$0xff] }
 0x12e   : > { %1402 = vmatpush.msrb.mxu0 %v1863_v55  ;;  %v1875_v55 = vld [vmem:[%s3177_s5 + $0x118] sm:$0xff] }
 0x130   : > { %1403 = vmatpush.msrb.mxu0 %v1862_v1  ;;  %v1891_v1 = vld [vmem:[%s3177_s5 + $0x198] sm:$0xff] }
 0x132   : > { %1404 = vmatpush.msrb.mxu0 %v1861_v32  ;;  %v1911_v32 = vld [vmem:[%s3177_s5 + $0x238] sm:$0xff] }
 0x134   : > { %v962_v42 = vld [vmem:[#allocation3 + $0x1] sm:$0xff]  ;;  %v963_v53 = vld [vmem:[#allocation3 + $0x9] sm:$0x3]  ;;  %v1175_v11 = vld [vmem:[#allocation3 + $0xb] sm:$0x3]  ;;  %1405 = vmatpush.msrb.mxu0 %v1860_v34 }
 0x135   : > { %v929_v43 = vld [vmem:[#allocation3 + $0x8] sm:$0x3]  ;;  %1013 = vmatmul.f32.vlgmr.msra.gmra.mxu2 %v962_v42  ;;  %1036 = vmatmul.f32.vlgmr.msra.gmra.mxu3 %v962_v42  ;;  %v1090_v15 = vld [vmem:[#allocation3 + $0xa] sm:$0x3]  ;;  %v1260_v60 = vld [vmem:[#allocation3 + $0xc] sm:$0x3] }
 0x136   : > { %1062 = vmatmul.f32.gmra.mxu0 %v929_v43  ;;  %1085 = vmatmul.f32.gmra.mxu1 %v929_v43  ;;  %v1174_v62 = vld [vmem:[#allocation3 + $0x3] sm:$0xff]  ;;  %v1874_v34 = vld [vmem:[%s3177_s5 + $0x110] sm:$0xff] }
 0x137   : > { %1294 = vmatpush.msra.mxu2 %v1292_v41  ;;  %1317 = vmatpush.msra.mxu3 %v1293_v46  ;;  %v1089_v5 = vld [vmem:[#allocation3 + $0x2] sm:$0xff] }
 0x138   : > { %v1259_v24 = vld [vmem:[#allocation3 + $0x4] sm:$0xff]  ;;  %1406 = vmatpush.msrb.mxu0 %v1859_v36 }
 0x139   : > { %1295 = vmatpush.msra.mxu2 %v1290_v47  ;;  %1318 = vmatpush.msra.mxu3 %v1291_v48  ;;  %v1370_v41 = vld [vmem:[%s3177_s5 + $0x60] sm:$0xff]  ;;  %v1885_v42 = vld [vmem:[%s3177_s5 + $0x168] sm:$0xff]  ;;  %v1369_v47 = vld [vmem:[%s3177_s5 + $0x58] sm:$0xff] }
 0x13a   : > { %1407 = vmatpush.msrb.mxu0 %v1858_v40  ;;  %v1901_v43 = vld [vmem:[%s3177_s5 + $0x1e8] sm:$0xff]  ;;  %1417 = vmatpush.msrb.mxu1 %v1370_v41  ;;  %v1884_v48 = vld [vmem:[%s3177_s5 + $0x160] sm:$0xff] }
 0x13b   : > { %1296 = vmatpush.msra.mxu2 %v1288_v49  ;;  %1319 = vmatpush.msra.mxu3 %v1289_v50  ;;  %v1857_v46 = vld [vmem:[%s3177_s5 + $0x88] sm:$0xff]  ;;  %v1900_v49 = vld [vmem:[%s3177_s5 + $0x1e0] sm:$0xff] }
 0x13c   : > { %1408 = vmatpush.msrb.mxu0 %v1857_v46  ;;  %1418 = vmatpush.msrb.mxu1 %v1369_v47  ;;  %v1856_v50 = vld [vmem:[%s3177_s5 + $0x80] sm:$0xff]  ;;  %v1873_v36 = vld [vmem:[%s3177_s5 + $0x108] sm:$0xff] }
 0x13d   : > { %1297 = vmatpush.msra.mxu2 %v1286_v51  ;;  %1320 = vmatpush.msra.mxu3 %v1287_v52  ;;  %v1368_v51 = vld [vmem:[%s3177_s5 + $0x50] sm:$0xff]  ;;  %v1883_v52 = vld [vmem:[%s3177_s5 + $0x158] sm:$0xff]  ;;  %v1909_v40 = vld [vmem:[%s3177_s5 + $0x228] sm:$0xff] }
 0x13e   : > { %1016 = vmatmul.f32.gmra.mxu2 %v963_v53  ;;  %1039 = vmatmul.f32.gmra.mxu3 %v963_v53  ;;  %v1899_v53 = vld [vmem:[%s3177_s5 + $0x1d8] sm:$0xff]  ;;  %v1872_v47 = vld [vmem:[%s3177_s5 + $0x100] sm:$0xff] }
 0x13f   : > { %1225 = vmatmul.f32.vlgmr.msra.gmra.mxu0 %v1174_v62  ;;  %1248 = vmatmul.f32.vlgmr.msra.gmra.mxu1 %v1174_v62  ;;  %v1919_v62 = vld [vmem:[%s3177_s5 + $0x278] sm:$0xff] }
 0x140   : > { %1298 = vmatpush.msra.mxu2 %v1284_v58  ;;  %1321 = vmatpush.msra.mxu3 %v1285_v59 }
 0x141   : > { %1409 = vmatpush.msrb.mxu0 %v1856_v50  ;;  %1419 = vmatpush.msrb.mxu1 %v1368_v51  ;;  %v1907_v50 = vld [vmem:[%s3177_s5 + $0x218] sm:$0xff]  ;;  %v1906_v51 = vld [vmem:[%s3177_s5 + $0x210] sm:$0xff] }
 0x142   : > { %1299 = vmatpush.msra.mxu2 %v1282_v3  ;;  %1322 = vmatpush.msra.mxu3 %v1283_v56  ;;  %v1367_v3 = vld [vmem:[%s3177_s5 + $0x48] sm:$0xff]  ;;  %v1882_v56 = vld [vmem:[%s3177_s5 + $0x150] sm:$0xff] }
 0x143   : > { %1533 = vmatpush.msra.mxu0 %v1919_v62  ;;  %1420 = vmatpush.msrb.mxu1 %v1367_v3 }
 0x144   : > { %1300 = vmatpush.msra.mxu2 %v1280_v20  ;;  %1323 = vmatpush.msra.mxu3 %v1281_v57  ;;  %v1898_v20 = vld [vmem:[%s3177_s5 + $0x1d0] sm:$0xff] }
 0x145   : > { %v1918_v57 = vld [vmem:[%s3177_s5 + $0x270] sm:$0xff] }
 0x146   : > { %1301 = vmatpush.msra.mxu2 %v1278_v21  ;;  %1324 = vmatpush.msra.mxu3 %v1279_v4  ;;  %v1366_v21 = vld [vmem:[%s3177_s5 + $0x40] sm:$0xff]  ;;  %v1881_v4 = vld [vmem:[%s3177_s5 + $0x148] sm:$0xff] }
 0x147   : > { %1140 = vmatmul.f32.vlgmr.msrb.gmra.mxu2 %v1089_v5  ;;  %1163 = vmatmul.f32.vlgmr.msrb.gmra.mxu3 %v1089_v5  ;;  %v1897_v5 = vld [vmem:[%s3177_s5 + $0x1c8] sm:$0xff] }
 0x148   : > { %1228 = vmatmul.f32.gmra.mxu0 %v1175_v11  ;;  %1251 = vmatmul.f32.gmra.mxu1 %v1175_v11  ;;  %v1917_v11 = vld [vmem:[%s3177_s5 + $0x268] sm:$0xff] }
 0x149   : > { %1302 = vmatpush.msra.mxu2 %v1276_v6  ;;  %1325 = vmatpush.msra.mxu3 %v1277_v10 }
 0x14a   : > { %1534 = vmatpush.msra.mxu0 %v1918_v57  ;;  %1421 = vmatpush.msrb.mxu1 %v1366_v21 }
 0x14b   : > { %1303 = vmatpush.msra.mxu2 %v1274_v7  ;;  %1326 = vmatpush.msra.mxu3 %v1275_v63  ;;  %v1365_v7 = vld [vmem:[%s3177_s5 + $0x38] sm:$0xff]  ;;  %v1880_v63 = vld [vmem:[%s3177_s5 + $0x140] sm:$0xff] }
 0x14c   : > { %1535 = vmatpush.msra.mxu0 %v1917_v11  ;;  %1422 = vmatpush.msrb.mxu1 %v1365_v7  ;;  %v1571_v7 = vld [vmem:[%s3179_s7 + $0x70] sm:$0xff] }
 0x14d   : > { %1304 = vmatpush.msra.mxu2 %v1272_v2  ;;  %1327 = vmatpush.msra.mxu3 %v1273_v8  ;;  %v1896_v2 = vld [vmem:[%s3177_s5 + $0x1c0] sm:$0xff] }
 0x14e   : > { %v1916_v8 = vld [vmem:[%s3177_s5 + $0x260] sm:$0xff] }
 0x14f   : > { %1305 = vmatpush.msra.mxu2 %v1270_v9  ;;  %1328 = vmatpush.msra.mxu3 %v1271_v12  ;;  %v1364_v9 = vld [vmem:[%s3177_s5 + $0x30] sm:$0xff]  ;;  %v1879_v12 = vld [vmem:[%s3177_s5 + $0x138] sm:$0xff] }
 0x150   : > { %1143 = vmatmul.f32.gmra.mxu2 %v1090_v15  ;;  %1166 = vmatmul.f32.gmra.mxu3 %v1090_v15  ;;  %v1363_v15 = vld [vmem:[%s3177_s5 + $0x28] sm:$0xff] }
 0x151   : > { %1306 = vmatpush.msra.mxu2 %v1268_v13  ;;  %1329 = vmatpush.msra.mxu3 %v1269_v14  ;;  %v1895_v13 = vld [vmem:[%s3177_s5 + $0x1b8] sm:$0xff] }
 0x152   : > { %1536 = vmatpush.msra.mxu0 %v1916_v8  ;;  %1423 = vmatpush.msrb.mxu1 %v1364_v9  ;;  %v1915_v14 = vld [vmem:[%s3177_s5 + $0x258] sm:$0xff]  ;;  %v1569_v9 = vld [vmem:[%s3179_s7 + $0x60] sm:$0xff] }
 0x153   : > { %1307 = vmatpush.msra.mxu2 %v1266_v16  ;;  %1330 = vmatpush.msra.mxu3 %v1267_v17  ;;  %v1878_v16 = vld [vmem:[%s3177_s5 + $0x130] sm:$0xff] }
 0x154   : > { %1537 = vmatpush.msra.mxu0 %v1915_v14  ;;  %1424 = vmatpush.msrb.mxu1 %v1363_v15 }
 0x155   : > { %1308 = vmatpush.msra.mxu2 %v1264_v18  ;;  %1331 = vmatpush.msra.mxu3 %v1265_v19  ;;  %v1894_v19 = vld [vmem:[%s3177_s5 + $0x1b0] sm:$0xff] }
 0x157   : > { %1309 = vmatpush.msra.mxu2 %v1262_v22  ;;  %1332 = vmatpush.msra.mxu3 %v1263_v23  ;;  %v1914_v22 = vld [vmem:[%s3177_s5 + $0x250] sm:$0xff]  ;;  %v1362_v23 = vld [vmem:[%s3177_s5 + $0x20] sm:$0xff] }
 0x158   : > { %1310 = vmatmul.f32.vlgmr.msra.gmra.mxu2 %v1259_v24  ;;  %1333 = vmatmul.f32.vlgmr.msra.gmra.mxu3 %v1259_v24  ;;  %v1877_v24 = vld [vmem:[%s3177_s5 + $0x128] sm:$0xff] }
 0x159   : > { %1453 = vmatpush.msrb.mxu2 %v1887_v35  ;;  %1493 = vmatpush.msrb.mxu3 %v1903_v29  ;;  %v1910_v35 = vld [vmem:[%s3177_s5 + $0x230] sm:$0xff]  ;;  %v1358_v29 = vld [vmem:[%s3177_s5] sm:$0xff] }
 0x15a   : > { %1538 = vmatpush.msra.mxu0 %v1914_v22  ;;  %1425 = vmatpush.msrb.mxu1 %v1362_v23 }
 0x15b   : > { %1454 = vmatpush.msrb.mxu2 %v1886_v38  ;;  %1494 = vmatpush.msrb.mxu3 %v1902_v39  ;;  %v1889_v39 = vld [vmem:[%s3177_s5 + $0x188] sm:$0xff] }
 0x15c   : > { %1539 = vmatpush.msra.mxu0 %v1913_v61  ;;  %1426 = vmatpush.msrb.mxu1 %v1361_v44 }
 0x15d   : > { %1455 = vmatpush.msrb.mxu2 %v1885_v42  ;;  %1495 = vmatpush.msrb.mxu3 %v1901_v43 }
 0x15e   : > { %1540 = vmatpush.msra.mxu0 %v1912_v0  ;;  %1427 = vmatpush.msrb.mxu1 %v1360_v27  ;;  %v1565_v0 = vld [vmem:[%s3179_s7 + $0x40] sm:$0xff]  ;;  %v1564_v27 = vld [vmem:[%s3179_s7 + $0x38] sm:$0xff] }
 0x15f   : > { %1456 = vmatpush.msrb.mxu2 %v1884_v48  ;;  %1496 = vmatpush.msrb.mxu3 %v1900_v49  ;;  %v1888_v48 = vld [vmem:[%s3177_s5 + $0x180] sm:$0xff] }
 0x160   : > { %1313 = vmatmul.f32.gmra.mxu2 %v1260_v60  ;;  %1336 = vmatmul.f32.gmra.mxu3 %v1260_v60  ;;  %v1893_v60 = vld [vmem:[%s3177_s5 + $0x1a8] sm:$0xff] }
 0x161   : > { %1457 = vmatpush.msrb.mxu2 %v1883_v52  ;;  %1497 = vmatpush.msrb.mxu3 %v1899_v53 }
 0x162   : > { %1541 = vmatpush.msra.mxu0 %v1911_v32  ;;  %1428 = vmatpush.msrb.mxu1 %v1359_v33  ;;  %v1561_v32 = vld [vmem:[%s3179_s7 + $0x20] sm:$0xff]  ;;  %v1560_v33 = vld [vmem:[%s3179_s7 + $0x18] sm:$0xff] }
 0x163   : > { %1458 = vmatpush.msrb.mxu2 %v1882_v56  ;;  %1498 = vmatpush.msrb.mxu3 %v1898_v20  ;;  %v1905_v56 = vld [vmem:[%s3177_s5 + $0x208] sm:$0xff] }
 0x164   : > { %1542 = vmatpush.msra.mxu0 %v1910_v35  ;;  %1429 = vmatpush.msrb.mxu1 %v1358_v29  ;;  %v1557_v35 = vld [vmem:[%s3179_s7] sm:$0xff]  ;;  %v1608_v29 = vld [vmem:[%s3181_s9 + $0x50] sm:$0xf] }
 0x165   : > { %1459 = vmatpush.msrb.mxu2 %v1881_v4  ;;  %1499 = vmatpush.msrb.mxu3 %v1897_v5  ;;  %v1904_v5 = vld [vmem:[%s3177_s5 + $0x200] sm:$0xff] }
 0x166   : > { %1543 = vmatpush.msra.mxu0 %v1909_v40  ;;  %1578 = vmatpush.msra.mxu1 %v1571_v7  ;;  %v1603_v40 = vld [vmem:[%s3181_s9 + $0x28] sm:$0xff] }
 0x167   : > { %1460 = vmatpush.msrb.mxu2 %v1880_v63  ;;  %1500 = vmatpush.msrb.mxu3 %v1896_v2 }
 0x169   : > { %1461 = vmatpush.msrb.mxu2 %v1879_v12  ;;  %1501 = vmatpush.msrb.mxu3 %v1895_v13 }
 0x16b   : > { %1462 = vmatpush.msrb.mxu2 %v1878_v16  ;;  %1502 = vmatpush.msrb.mxu3 %v1894_v19  ;;  %v1568_v16 = vld [vmem:[%s3179_s7 + $0x58] sm:$0xff]  ;;  %v1978_v19 = vld [vmem:[%s3176_s4] ss:$0 sm:$0xff] }
 0x16d   : > { %1463 = vmatpush.msrb.mxu2 %v1877_v24  ;;  %1503 = vmatpush.msrb.mxu3 %v1893_v60 }
 0x16f   : > { %1464 = vmatpush.msrb.mxu2 %v1876_v45  ;;  %1504 = vmatpush.msrb.mxu3 %v1892_v54  ;;  %v1566_v54 = vld [vmem:[%s3179_s7 + $0x48] sm:$0xff] }
 0x171   : > { %1465 = vmatpush.msrb.mxu2 %v1875_v55  ;;  %1505 = vmatpush.msrb.mxu3 %v1891_v1  ;;  %v1563_v55 = vld [vmem:[%s3179_s7 + $0x30] sm:$0xff]  ;;  %v1562_v1 = vld [vmem:[%s3179_s7 + $0x28] sm:$0xff] }
 0x173   : > { %1466 = vmatpush.msrb.mxu2 %v1874_v34  ;;  %1506 = vmatpush.msrb.mxu3 %v1890_v28  ;;  %v1559_v34 = vld [vmem:[%s3179_s7 + $0x10] sm:$0xff]  ;;  %v1558_v28 = vld [vmem:[%s3179_s7 + $0x8] sm:$0xff] }
 0x175   : > { %1467 = vmatpush.msrb.mxu2 %v1873_v36  ;;  %1507 = vmatpush.msrb.mxu3 %v1889_v39  ;;  %v1607_v36 = vld [vmem:[%s3181_s9 + $0x48] sm:$0xff]  ;;  %v1604_v39 = vld [vmem:[%s3181_s9 + $0x30] sm:$0xff] }
 0x177   : > { %1468 = vmatpush.msrb.mxu2 %v1872_v47  ;;  %1508 = vmatpush.msrb.mxu3 %v1888_v48 }
 0x179   : > { %1921 = vmatpush.msk.msra.mxu2 %vm1614_vm0, %v1608_v29 }
 0x17b   : > { %1624 = vmatpush.msra.mxu2 %v1607_v36 }
 0x19a   : > { %v2920_v6 = vpop.f32.mrf.mxu0  ;;  %v2922_v10 = vpop.f32.mrf.mxu1 }
 0x1b3   : > { %v1063_v25 = vpop.f32.mrf.mxu0  ;;  %v1086_v26 = vpop.f32.mrf.mxu1 }
 0x1b8   : > { %v2843_v30 = vpop.f32.mrf.mxu2  ;;  %v2845_v37 = vpop.f32.mrf.mxu3 }
 0x1b9   : > { %v1061_v41 = vadd.f32 %v2920_v6, %v2843_v30  ;;  %v1084_v42 = vadd.f32 %v2922_v10, %v2845_v37  ;;  %v1908_v30 = vld [vmem:[%s3177_s5 + $0x220] sm:$0xff] }
 0x1ba   : > { %1544 = vmatpush.msra.mxu0 %v1908_v30 }
 0x1bc   : > { %v1226_v37 = vpop.f32.mrf.mxu0  ;;  %v1249_v49 = vpop.f32.mrf.mxu1  ;;  %1545 = vmatpush.msra.mxu0 %v1907_v50 }
 0x1be   : > { %1546 = vmatpush.msra.mxu0 %v1906_v51  ;;  %v1554_v51 = vld [vmem:[%s3178_s6] sm:$0x1] }
 0x1c0   : > { %1547 = vmatpush.msra.mxu0 %v1905_v56  ;;  %v1599_v56 = vld [vmem:[%s3181_s9 + $0x8] sm:$0xff] }
 0x1c1   : > { %v2892_v58 = vpop.f32.mrf.mxu2  ;;  %v2894_v59 = vpop.f32.mrf.mxu3 }
 0x1c2   : > { %v1064_v20 = vadd.f32 %v1063_v25, %v2892_v58  ;;  %v1087_v57 = vadd.f32 %v1086_v26, %v2894_v59  ;;  %1548 = vmatpush.msra.mxu0 %v1904_v5  ;;  %v1570_v58 = vld [vmem:[%s3179_s7 + $0x68] sm:$0xff] }
 0x1c3   : > { %1579 = vmatpush.msra.mxu1 %v1570_v58 }
 0x1c5   : > { %v1229_v59 = vpop.f32.mrf.mxu0  ;;  %v1252_v63 = vpop.f32.mrf.mxu1  ;;  %1580 = vmatpush.msra.mxu1 %v1569_v9 }
 0x1c7   : > { %1581 = vmatpush.msra.mxu1 %v1568_v16 }
 0x1ca   : > { %v1141_v17 = vpop.f32.mrf.mxu2  ;;  %v1164_v18 = vpop.f32.mrf.mxu3 }
 0x1cb   : > { %v1170_v43 = vadd.f32 %v1141_v17, %v1061_v41  ;;  %v1171_v46 = vadd.f32 %v1164_v18, %v1084_v42  ;;  %v1567_v18 = vld [vmem:[%s3179_s7 + $0x50] sm:$0xff]  ;;  %v1602_v41 = vld [vmem:[%s3181_s9 + $0x20] sm:$0xff]  ;;  %v1601_v42 = vld [vmem:[%s3181_s9 + $0x18] sm:$0xff] }
 0x1cc   : > { %1582 = vmatpush.msra.mxu1 %v1567_v18 }
 0x1cd   : > { %v1255_v52 = vadd.f32 %v1226_v37, %v1170_v43  ;;  %v1256_v53 = vadd.f32 %v1249_v49, %v1171_v46 }
 0x1ce   : > { %1583 = vmatpush.msra.mxu1 %v1566_v54 }
 0x1d0   : > { %1584 = vmatpush.msra.mxu1 %v1565_v0 }
 0x1d2   : > { %1585 = vmatpush.msra.mxu1 %v1564_v27 }
 0x1d3   : > { %v1144_v31 = vpop.f32.mrf.mxu2  ;;  %v1167_v38 = vpop.f32.mrf.mxu3 }
 0x1d4   : > { %v1172_v6 = vadd.f32 %v1144_v31, %v1064_v20  ;;  %v1173_v10 = vadd.f32 %v1167_v38, %v1087_v57  ;;  %1586 = vmatpush.msra.mxu1 %v1563_v55  ;;  %v1606_v31 = vld [vmem:[%s3181_s9 + $0x40] sm:$0xff]  ;;  %v1605_v38 = vld [vmem:[%s3181_s9 + $0x38] sm:$0xff] }
 0x1d5   : > { %1625 = vmatpush.msra.mxu2 %v1606_v31  ;;  %v1598_v20 = vld [vmem:[%s3181_s9] sm:$0xff] }
 0x1d6   : > { %v1257_v2 = vadd.f32 %v1229_v59, %v1172_v6  ;;  %v1258_v8 = vadd.f32 %v1252_v63, %v1173_v10  ;;  %1587 = vmatpush.msra.mxu1 %v1562_v1  ;;  %v1572_v57 = vld [vmem:[%s3180_s8] sm:$0x1] }
 0x1d7   : > { %1626 = vmatpush.msra.mxu2 %v1605_v38  ;;  %v1609_v6 = vld [vmem:[%s3182_s10] sm:$0x1] }
 0x1d8   : > { %1588 = vmatpush.msra.mxu1 %v1561_v32 }
 0x1d9   : > { %1627 = vmatpush.msra.mxu2 %v1604_v39 }
 0x1da   : > { %1589 = vmatpush.msra.mxu1 %v1560_v33 }
 0x1db   : > { %v1311_v62 = vpop.f32.mrf.mxu2  ;;  %v1334_v3 = vpop.f32.mrf.mxu3  ;;  %1628 = vmatpush.msra.mxu2 %v1603_v40 }
 0x1dc   : > { %v1340_v21 = vadd.f32 %v1311_v62, %v1255_v52  ;;  %v1341_v4 = vadd.f32 %v1334_v3, %v1256_v53  ;;  %1590 = vmatpush.msra.mxu1 %v1559_v34  ;;  %v1600_v3 = vld [vmem:[%s3181_s9 + $0x10] sm:$0xff] }
 0x1dd   : > { %1629 = vmatpush.msra.mxu2 %v1602_v41 }
 0x1de   : > { %v1344_v11 = vmax.f32 %v1340_v21, %v1341_v4  ;;  %1591 = vmatpush.msra.mxu1 %v1558_v28 }
 0x1df   : > { %1630 = vmatpush.msra.mxu2 %v1601_v42 }
 0x1e0   : > { %1346 = vst [vmem:[#allocation4] sm:$0xff] %v1344_v11  ;;  %1592 = vmatpush.msra.mxu1 %v1557_v35 }
 0x1e1   : > { %1631 = vmatpush.msra.mxu2 %v1600_v3 }
 0x1e3   : > { %v1314_v12 = vpop.f32.mrf.mxu2  ;;  %v1337_v13 = vpop.f32.mrf.mxu3  ;;  %1632 = vmatpush.msra.mxu2 %v1599_v56 }
 0x1e4   : > { %v1342_v14 = vadd.f32 %v1314_v12, %v1257_v2  ;;  %v1343_v15 = vadd.f32 %v1337_v13, %v1258_v8 }
 0x1e5   : > { %1633 = vmatpush.msra.mxu2 %v1598_v20 }
 0x1e6   : > { %v1345_v17 = vmax.f32 %v1342_v14, %v1343_v15 }
 0x1e8   : > { %1347 = vst [vmem:[#allocation4 + $0x8] sm:$0x3] %v1345_v17 }
 0x1ef   : > { %v1348_v22 = vld [vmem:[#allocation4] ss:$2 sm:$0x1f]  ;;  %v1350_v23 = vld [vmem:[#allocation4 + $0x1] ss:$2 sm:$0x1f] }
 0x1f0   : > { %v1351_v24 = vmax.f32 %v1348_v22, %v1350_v23 }
 0x1f2   : > { %v1356_v60 = vadd.f32 %v1978_v19, %v1351_v24 }
 0x1f4   : > { %v1357_v61 = vmax.f32 %v1356_v60, 0.0 }
 0x1f6   : > { %1430 = vmatmul.f32.vlgmr.msrb.gmra.mxu1 %v1357_v61  ;;  %v1392_v44 = vrot.slane %v1357_v61, 1  ;;  %v1451_v45 = vrot.slane %v1357_v61, 2  ;;  %v1491_v25 = vrot.slane %v1357_v61, 3  ;;  %v1531_v26 = vrot.slane %v1357_v61, 4 }
 0x1f8   : > { %1410 = vmatmul.f32.vlgmr.msrb.gmra.mxu0 %v1392_v44  ;;  %1469 = vmatmul.f32.vlgmr.msrb.gmra.mxu2 %v1451_v45 }
 0x1f9   : > { %1509 = vmatmul.f32.vlgmr.msrb.gmra.mxu3 %v1491_v25 }
 0x200   : > { %1549 = vmatmul.f32.vlgmr.msra.gmra.mxu0 %v1531_v26 }
 0x273   : > { %v1431_v46 = vpop.f32.mrf.mxu1 }
 0x275   : > { %v1411_v43 = vpop.f32.mrf.mxu0 }
 0x276   : > { %v1432_v47 = vadd.f32 %v1431_v46, %v1411_v43 }
 0x27b   : > { %v1470_v48 = vpop.f32.mrf.mxu2 }
 0x27c   : > { %v1473_v30 = vadd.f32 %v1470_v48, %v1432_v47  ;;  %v1510_v37 = vpop.f32.mrf.mxu3 }
 0x27d   : > { %v1550_v50 = vpop.f32.mrf.mxu0 }
 0x27e   : > { %v1513_v49 = vadd.f32 %v1510_v37, %v1473_v30 }
 0x280   : > { %v1553_v52 = vadd.f32 %v1550_v50, %v1513_v49 }
 0x282   : > { %v1555_v53 = vadd.f32 %v1554_v51, %v1553_v52 }
 0x284   : > { %v1556_v62 = vmax.f32 %v1555_v53, 0.0 }
 0x286   : > { %1920 = vmatmul.msk.f32.vlgmr.msra.gmra.mxu1 %vm1573_vm1, %v1556_v62 }
 0x303   : > { %v1594_v21 = vpop.f32.mrf.mxu1 }
 0x304   : > { %v1595_v4 = vadd.f32 %v1594_v21, %v1572_v57 }
 0x306   : > { %v1597_v5 = vmax.f32 %v1595_v4, 0.0 }
 0x308   : > { %1922 = vmatmul.msk.f32.vlgmr.msra.gmra.mxu2 %vm1610_vm2, %v1597_v5 }
 0x38b   : > { %v1635_v10 = vpop.f32.mrf.mxu2 }
 0x38c   : > { %v1636_v11 = vadd.f32 %v1635_v10, %v1609_v6 }
 0x38e   : > { %1639 = vst.msk [vmem:[%s396_s12] sm:$0x1] %vm1638_vm3, %v1636_v11 }
 0x38f   : > { %2036 = shalt.err (!%p2033_p8)
}
 0x390   : > { %1929 = dma.vmem_to_hbm [thread:$0]  (%p2178_p5), %s1652_s14, 16, %s1654_s26, %s1641_s16  }
 0x391 PF: > { %p1941_p9 = scmp.ge.s32.totalorder %s2075_s20, 2  ;;  %s1665_s24 = sand.u32 1, %s2063_s17  }
 0x392   : > { %s1666_s3 = scalar_lea.sflag [#allocation7], %s1665_s24 }
 0x393   : > { %p1936_p10 = pnand %p1941_p9, %p2182_p6 }
 0x395   : > { %p1937_p11 = pneg %p1936_p10 }
 0x397   : > { %2058 = dma.done.wait (%p1937_p11), %s1666_s3, 16  }
 0x398   : > { %2060 = vsyncadd (%p1937_p11), %s1666_s3, 4294967280  ;;  %s3192_s12 = sld [smem:[#allocation11_spill]]  ;;  %p22_p12 = scmp.ge.s32.totalorder %s2165_s23, 4  }
 0x399   : > { %s3193_s17 = smov %s2067_s18  ;;  %s3194_s18 = smov %s2071_s19 }
 0x39a   : > { %s3196_s20 = smov %s2165_s23  ;;  %24 = sbr.rel (!%p22_p12) target bundleno = 6 (0x6), region = 120 }
 0x39e   : > { %s3195_s19 = smov %s3192_s12 }
 0x39f   :  { %1671 = vsyncpa [#allocation6], 1 }
 0x3a0   :  { %1673 = vsyncpa [#allocation6 + $0x1], 1 }
 0x3a1   :  { %1674 = vsyncpa [#allocation7], 1 }
 0x3a2   :  { %1676 = vsyncpa [#allocation7 + $0x1], 1 }

</bundles_post_ra>
